<compile_context>
chip_gen: v5e
topology: v5e:2x2
jax: 0.10.0
libtpu: 0.0.40
codegen_flags: <defaults>
</compile_context>

<pallas_src>
import jax
import jax.numpy as jnp
from jax.experimental import pallas as pl
from jax.experimental.pallas import tpu as pltpu

BN_EPS = 1e-5


# ----------------------------- Pallas kernel -------------------------------
def _make_bridge_kernel(H, W, C, L):
    W2 = W + 2
    PP = (H + 2) * W2          # padded, flattened spatial size
    CENTER = W2 + 1            # flat offset of the (ky=1, kx=1) center tap
    EXT = PP + 2 * CENTER      # padded image + guard zones for the 9 tap shifts
    TAP_OFFSETS = [ky * W2 + kx for ky in range(3) for kx in range(3)]

    def kernel(x_ref, w_ref, s_ref, m_ref, o_ref, act_ref, col_ref):
        # act_ref: (C, EXT) f32.  The zero-padded activation image occupies
        # columns [CENTER, CENTER + PP); everything else stays zero
        # (padding halo + guard zones read only by masked border outputs).
        act_ref[...] = jnp.zeros_like(act_ref)

        # Scatter compact input rows (C, W) into the padded flat layout.
        for r in range(H):
            dst = CENTER + (r + 1) * W2 + 1
            act_ref[:, dst:dst + W] = x_ref[0, :, r * W:r * W + W]

        mask = m_ref[...]  # (1, PP): 1.0 on interior positions, 0.0 on halo

        for l in range(L):
            # im2col: 9 lane-shifted copies stacked along the contraction dim.
            for t in range(9):
                off = TAP_OFFSETS[t]
                col_ref[t * C:(t + 1) * C, :] = act_ref[:, off:off + PP]
            # One MXU matmul per layer: (C, 9C) @ (9C, PP) -> (C, PP),
            # lane-dense output/accumulator.
            y = jnp.dot(w_ref[l], col_ref[...],
                        preferred_element_type=jnp.float32)
            # conv bias + BatchNorm folded into w/shift; ReLU; the mask
            # re-zeroes the halo so y is the next layer's padded activation.
            y = jnp.maximum(y + s_ref[l], 0.0) * mask
            act_ref[:, CENTER:CENTER + PP] = y.astype(act_ref.dtype)

        # Gather interior rows back into the compact (C, H*W) output block.
        for r in range(H):
            src = CENTER + (r + 1) * W2 + 1
            o_ref[0, :, r * W:r * W + W] = act_ref[:, src:src + W]

    return kernel, PP, EXT


# ----------------------------- Parameter setup ------------------------------
def init_layer_params(key, channels):
    """One conv3x3 + BatchNorm layer, deterministically initialized."""
    kw, kb, kg, kbe, km, kv = jax.random.split(key, 6)
    # PyTorch conv weight layout: (Cout, Cin, 3, 3)
    w_oihw = 0.1 * jax.random.normal(kw, (channels, channels, 3, 3), jnp.float32)
    bias = 0.1 * jax.random.normal(kb, (channels,), jnp.float32)
    gamma = 1.0 + 0.1 * jax.random.normal(kg, (channels,), jnp.float32)
    beta = 0.1 * jax.random.normal(kbe, (channels,), jnp.float32)
    running_mean = 0.1 * jax.random.normal(km, (channels,), jnp.float32)
    running_var = 1.0 + 0.1 * jax.random.uniform(kv, (channels,), jnp.float32)
    return dict(w=w_oihw, b=bias, gamma=gamma, beta=beta,
                mean=running_mean, var=running_var)


def fold_layers(layer_params):
    """Fold conv bias + BatchNorm (eval mode) into weights and per-channel shift."""
    C = layer_params[0]["w"].shape[0]
    L = len(layer_params)
    ws, ss = [], []
    for p in layer_params:
        scale = p["gamma"] / jnp.sqrt(p["var"] + BN_EPS)                 # (C,)
        # (cout, cin, ky, kx) -> (cout, ky, kx, cin) -> (cout, 9*cin), BN-scaled
        wf = jnp.transpose(p["w"], (0, 2, 3, 1)).reshape(C, 9 * C) * scale[:, None]
        sf = (p["b"] - p["mean"]) * scale + p["beta"]                    # (C,)
        ws.append(wf)
        ss.append(sf)
    return jnp.stack(ws), jnp.stack(ss).reshape(L, C, 1)


# --------------------------------- Bridge -----------------------------------
# TODO(synk): BatchNorm implemented in eval (running-stats) mode; PyTorch
# training-mode batch statistics are not reproduced here.
@jax.jit
def bridge_forward(x_nchw, layer_params):
    """Bridge = 2 x ConvBlock = 4 x (conv3x3 + BN + ReLU), fused in one kernel."""
    N, C, H, W = x_nchw.shape
    L = len(layer_params)
    HW = H * W
    W2 = W + 2

    kernel, PP, EXT = _make_bridge_kernel(H, W, C, L)

    wf, sf = fold_layers(layer_params)                  # (L, C, 9C), (L, C, 1)
    mask = (jnp.zeros((H + 2, W2), jnp.float32)
            .at[1:H + 1, 1:W + 1].set(1.0)
            .reshape(1, PP))
    x_flat = x_nchw.reshape(N, C, HW)                   # free reshape (row-major NCHW)

    out_flat = pl.pallas_call(
        kernel,
        out_shape=jax.ShapeDtypeStruct((N, C, HW), x_nchw.dtype),
        grid=(N,),
        in_specs=[
            pl.BlockSpec((1, C, HW), lambda n: (n, 0, 0)),
            pl.BlockSpec((L, C, 9 * C), lambda n: (0, 0, 0)),
            pl.BlockSpec((L, C, 1), lambda n: (0, 0, 0)),
            pl.BlockSpec((1, PP), lambda n: (0, 0)),
        ],
        out_specs=pl.BlockSpec((1, C, HW), lambda n: (n, 0, 0)),
        scratch_shapes=[
            pltpu.VMEM((C, EXT), jnp.float32),          # padded flat activation
            pltpu.VMEM((9 * C, PP), jnp.float32),       # im2col buffer
        ],
        compiler_params=pltpu.CompilerParams(
            dimension_semantics=("parallel",)),         # batch-parallel (both v7x TCs)
    )(x_flat, wf, sf, mask)
    return out_flat.reshape(N, C, H, W)


# ------------------------- Pure-JAX reference (check) -----------------------
def reference_forward(x_nchw, layer_params):
    x = jnp.transpose(x_nchw, (0, 2, 3, 1))  # NHWC
    for p in layer_params:
        w_hwio = jnp.transpose(p["w"], (2, 3, 1, 0))
        y = jax.lax.conv_general_dilated(
            x, w_hwio, window_strides=(1, 1), padding="SAME",
            dimension_numbers=("NHWC", "HWIO", "NHWC"))
        y = y + p["b"]
        scale = p["gamma"] / jnp.sqrt(p["var"] + BN_EPS)
        shift = p["beta"] - p["mean"] * scale
        y = y * scale + shift
        x = jnp.maximum(y, 0.0)
    return jnp.transpose(x, (0, 3, 1, 2))


# ----------------------------------- Main -----------------------------------
if __name__ == "__main__":
    key = jax.random.PRNGKey(0)
    N, C, H, W = 2, 4, 16, 16

    k_x, *layer_keys = jax.random.split(key, 1 + 4)
    x = jax.random.normal(k_x, (N, C, H, W), jnp.float32)
    params = [init_layer_params(k, C) for k in layer_keys]  # 4 conv/BN layers

    out = bridge_forward(x, params)
    out = jax.block_until_ready(out)

    ref = reference_forward(x, params)
    assert out.shape == (N, C, H, W)
    assert jnp.allclose(out, ref, atol=1e-4, rtol=1e-4), "mismatch vs JAX reference"

    print("KERNEL_OK")
</pallas_src>

<mosaic_0001>
module attributes {stable_mosaic.version = 11 : i64} {
  func.func @kernel(%arg0: i32, %arg1: memref<1x4x256xf32, #tpu.memory_space<vmem>>, %arg2: memref<4x4x36xf32, #tpu.memory_space<vmem>>, %arg3: memref<4x4x1xf32, #tpu.memory_space<vmem>>, %arg4: memref<1x324xf32, #tpu.memory_space<vmem>>, %arg5: memref<1x4x256xf32, #tpu.memory_space<vmem>>, %arg6: memref<4x362xf32, #tpu.memory_space<vmem>>, %arg7: memref<36x324xf32, #tpu.memory_space<vmem>>) attributes {dimension_semantics = [#tpu.dimension_semantics<parallel>], iteration_bounds = array<i64: 2>, scalar_prefetch = 0 : i64, scratch_operands = 2 : i64, tpu.core_type = #tpu.core_type<tc>, window_params = [{transform_indices = @transform_0, window_bounds = array<i64: 1, 4, 256>}, {pipeline_mode = #tpu.pipeline_mode<synchronous>, transform_indices = @transform_1, window_bounds = array<i64: 4, 4, 36>}, {pipeline_mode = #tpu.pipeline_mode<synchronous>, transform_indices = @transform_2, window_bounds = array<i64: 4, 4, 1>}, {pipeline_mode = #tpu.pipeline_mode<synchronous>, transform_indices = @transform_3, window_bounds = array<i64: 1, 324>}, {transform_indices = @transform_4, window_bounds = array<i64: 1, 4, 256>}]} {
    %cst = arith.constant 0.000000e+00 : f32
    %0 = vector.broadcast %cst : f32 to vector<4x362xf32>
    %c0 = arith.constant 0 : index
    %c0_0 = arith.constant 0 : index
    %1 = vector.load %arg6[%c0, %c0_0] : memref<4x362xf32, #tpu.memory_space<vmem>>, vector<4x362xf32>
    tpu.vector_store %arg6[%c0, %c0_0], %0 {strides = array<i32>} : memref<4x362xf32, #tpu.memory_space<vmem>>, vector<4x362xf32>,
    %c0_1 = arith.constant 0 : index
    %c0_2 = arith.constant 0 : index
    %c0_3 = arith.constant 0 : index
    %2 = vector.load %arg1[%c0_1, %c0_2, %c0_3] : memref<1x4x256xf32, #tpu.memory_space<vmem>>, vector<1x4x16xf32>
    %3 = vector.shape_cast %2 : vector<1x4x16xf32> to vector<4x16xf32>
    %c0_4 = arith.constant 0 : index
    %c38 = arith.constant 38 : index
    %4 = vector.load %arg6[%c0_4, %c38] : memref<4x362xf32, #tpu.memory_space<vmem>>, vector<4x16xf32>
    tpu.vector_store %arg6[%c0_4, %c38], %3 {strides = array<i32>} : memref<4x362xf32, #tpu.memory_space<vmem>>, vector<4x16xf32>,
    %c0_5 = arith.constant 0 : index
    %c0_6 = arith.constant 0 : index
    %c16 = arith.constant 16 : index
    %5 = vector.load %arg1[%c0_5, %c0_6, %c16] : memref<1x4x256xf32, #tpu.memory_space<vmem>>, vector<1x4x16xf32>
    %6 = vector.shape_cast %5 : vector<1x4x16xf32> to vector<4x16xf32>
    %c0_7 = arith.constant 0 : index
    %c56 = arith.constant 56 : index
    %7 = vector.load %arg6[%c0_7, %c56] : memref<4x362xf32, #tpu.memory_space<vmem>>, vector<4x16xf32>
    tpu.vector_store %arg6[%c0_7, %c56], %6 {strides = array<i32>} : memref<4x362xf32, #tpu.memory_space<vmem>>, vector<4x16xf32>,
    %c0_8 = arith.constant 0 : index
    %c0_9 = arith.constant 0 : index
    %c32 = arith.constant 32 : index
    %8 = vector.load %arg1[%c0_8, %c0_9, %c32] : memref<1x4x256xf32, #tpu.memory_space<vmem>>, vector<1x4x16xf32>
    %9 = vector.shape_cast %8 : vector<1x4x16xf32> to vector<4x16xf32>
    %c0_10 = arith.constant 0 : index
    %c74 = arith.constant 74 : index
    %10 = vector.load %arg6[%c0_10, %c74] : memref<4x362xf32, #tpu.memory_space<vmem>>, vector<4x16xf32>
    tpu.vector_store %arg6[%c0_10, %c74], %9 {strides = array<i32>} : memref<4x362xf32, #tpu.memory_space<vmem>>, vector<4x16xf32>,
    %c0_11 = arith.constant 0 : index
    %c0_12 = arith.constant 0 : index
    %c48 = arith.constant 48 : index
    %11 = vector.load %arg1[%c0_11, %c0_12, %c48] : memref<1x4x256xf32, #tpu.memory_space<vmem>>, vector<1x4x16xf32>
    %12 = vector.shape_cast %11 : vector<1x4x16xf32> to vector<4x16xf32>
    %c0_13 = arith.constant 0 : index
    %c92 = arith.constant 92 : index
    %13 = vector.load %arg6[%c0_13, %c92] : memref<4x362xf32, #tpu.memory_space<vmem>>, vector<4x16xf32>
    tpu.vector_store %arg6[%c0_13, %c92], %12 {strides = array<i32>} : memref<4x362xf32, #tpu.memory_space<vmem>>, vector<4x16xf32>,
    %c0_14 = arith.constant 0 : index
    %c0_15 = arith.constant 0 : index
    %c64 = arith.constant 64 : index
    %14 = vector.load %arg1[%c0_14, %c0_15, %c64] : memref<1x4x256xf32, #tpu.memory_space<vmem>>, vector<1x4x16xf32>
    %15 = vector.shape_cast %14 : vector<1x4x16xf32> to vector<4x16xf32>
    %c0_16 = arith.constant 0 : index
    %c110 = arith.constant 110 : index
    %16 = vector.load %arg6[%c0_16, %c110] : memref<4x362xf32, #tpu.memory_space<vmem>>, vector<4x16xf32>
    tpu.vector_store %arg6[%c0_16, %c110], %15 {strides = array<i32>} : memref<4x362xf32, #tpu.memory_space<vmem>>, vector<4x16xf32>,
    %c0_17 = arith.constant 0 : index
    %c0_18 = arith.constant 0 : index
    %c80 = arith.constant 80 : index
    %17 = vector.load %arg1[%c0_17, %c0_18, %c80] : memref<1x4x256xf32, #tpu.memory_space<vmem>>, vector<1x4x16xf32>
    %18 = vector.shape_cast %17 : vector<1x4x16xf32> to vector<4x16xf32>
    %c0_19 = arith.constant 0 : index
    %c128 = arith.constant 128 : index
    %19 = vector.load %arg6[%c0_19, %c128] : memref<4x362xf32, #tpu.memory_space<vmem>>, vector<4x16xf32>
    tpu.vector_store %arg6[%c0_19, %c128], %18 {strides = array<i32>} : memref<4x362xf32, #tpu.memory_space<vmem>>, vector<4x16xf32>,
    %c0_20 = arith.constant 0 : index
    %c0_21 = arith.constant 0 : index
    %c96 = arith.constant 96 : index
    %20 = vector.load %arg1[%c0_20, %c0_21, %c96] : memref<1x4x256xf32, #tpu.memory_space<vmem>>, vector<1x4x16xf32>
    %21 = vector.shape_cast %20 : vector<1x4x16xf32> to vector<4x16xf32>
    %c0_22 = arith.constant 0 : index
    %c146 = arith.constant 146 : index
    %22 = vector.load %arg6[%c0_22, %c146] : memref<4x362xf32, #tpu.memory_space<vmem>>, vector<4x16xf32>
    tpu.vector_store %arg6[%c0_22, %c146], %21 {strides = array<i32>} : memref<4x362xf32, #tpu.memory_space<vmem>>, vector<4x16xf32>,
    %c0_23 = arith.constant 0 : index
    %c0_24 = arith.constant 0 : index
    %c112 = arith.constant 112 : index
    %23 = vector.load %arg1[%c0_23, %c0_24, %c112] : memref<1x4x256xf32, #tpu.memory_space<vmem>>, vector<1x4x16xf32>
    %24 = vector.shape_cast %23 : vector<1x4x16xf32> to vector<4x16xf32>
    %c0_25 = arith.constant 0 : index
    %c164 = arith.constant 164 : index
    %25 = vector.load %arg6[%c0_25, %c164] : memref<4x362xf32, #tpu.memory_space<vmem>>, vector<4x16xf32>
    tpu.vector_store %arg6[%c0_25, %c164], %24 {strides = array<i32>} : memref<4x362xf32, #tpu.memory_space<vmem>>, vector<4x16xf32>,
    %c0_26 = arith.constant 0 : index
    %c0_27 = arith.constant 0 : index
    %c128_28 = arith.constant 128 : index
    %26 = vector.load %arg1[%c0_26, %c0_27, %c128_28] : memref<1x4x256xf32, #tpu.memory_space<vmem>>, vector<1x4x16xf32>
    %27 = vector.shape_cast %26 : vector<1x4x16xf32> to vector<4x16xf32>
    %c0_29 = arith.constant 0 : index
    %c182 = arith.constant 182 : index
    %28 = vector.load %arg6[%c0_29, %c182] : memref<4x362xf32, #tpu.memory_space<vmem>>, vector<4x16xf32>
    tpu.vector_store %arg6[%c0_29, %c182], %27 {strides = array<i32>} : memref<4x362xf32, #tpu.memory_space<vmem>>, vector<4x16xf32>,
    %c0_30 = arith.constant 0 : index
    %c0_31 = arith.constant 0 : index
    %c144 = arith.constant 144 : index
    %29 = vector.load %arg1[%c0_30, %c0_31, %c144] : memref<1x4x256xf32, #tpu.memory_space<vmem>>, vector<1x4x16xf32>
    %30 = vector.shape_cast %29 : vector<1x4x16xf32> to vector<4x16xf32>
    %c0_32 = arith.constant 0 : index
    %c200 = arith.constant 200 : index
    %31 = vector.load %arg6[%c0_32, %c200] : memref<4x362xf32, #tpu.memory_space<vmem>>, vector<4x16xf32>
    tpu.vector_store %arg6[%c0_32, %c200], %30 {strides = array<i32>} : memref<4x362xf32, #tpu.memory_space<vmem>>, vector<4x16xf32>,
    %c0_33 = arith.constant 0 : index
    %c0_34 = arith.constant 0 : index
    %c160 = arith.constant 160 : index
    %32 = vector.load %arg1[%c0_33, %c0_34, %c160] : memref<1x4x256xf32, #tpu.memory_space<vmem>>, vector<1x4x16xf32>
    %33 = vector.shape_cast %32 : vector<1x4x16xf32> to vector<4x16xf32>
    %c0_35 = arith.constant 0 : index
    %c218 = arith.constant 218 : index
    %34 = vector.load %arg6[%c0_35, %c218] : memref<4x362xf32, #tpu.memory_space<vmem>>, vector<4x16xf32>
    tpu.vector_store %arg6[%c0_35, %c218], %33 {strides = array<i32>} : memref<4x362xf32, #tpu.memory_space<vmem>>, vector<4x16xf32>,
    %c0_36 = arith.constant 0 : index
    %c0_37 = arith.constant 0 : index
    %c176 = arith.constant 176 : index
    %35 = vector.load %arg1[%c0_36, %c0_37, %c176] : memref<1x4x256xf32, #tpu.memory_space<vmem>>, vector<1x4x16xf32>
    %36 = vector.shape_cast %35 : vector<1x4x16xf32> to vector<4x16xf32>
    %c0_38 = arith.constant 0 : index
    %c236 = arith.constant 236 : index
    %37 = vector.load %arg6[%c0_38, %c236] : memref<4x362xf32, #tpu.memory_space<vmem>>, vector<4x16xf32>
    tpu.vector_store %arg6[%c0_38, %c236], %36 {strides = array<i32>} : memref<4x362xf32, #tpu.memory_space<vmem>>, vector<4x16xf32>,
    %c0_39 = arith.constant 0 : index
    %c0_40 = arith.constant 0 : index
    %c192 = arith.constant 192 : index
    %38 = vector.load %arg1[%c0_39, %c0_40, %c192] : memref<1x4x256xf32, #tpu.memory_space<vmem>>, vector<1x4x16xf32>
    %39 = vector.shape_cast %38 : vector<1x4x16xf32> to vector<4x16xf32>
    %c0_41 = arith.constant 0 : index
    %c254 = arith.constant 254 : index
    %40 = vector.load %arg6[%c0_41, %c254] : memref<4x362xf32, #tpu.memory_space<vmem>>, vector<4x16xf32>
    tpu.vector_store %arg6[%c0_41, %c254], %39 {strides = array<i32>} : memref<4x362xf32, #tpu.memory_space<vmem>>, vector<4x16xf32>,
    %c0_42 = arith.constant 0 : index
    %c0_43 = arith.constant 0 : index
    %c208 = arith.constant 208 : index
    %41 = vector.load %arg1[%c0_42, %c0_43, %c208] : memref<1x4x256xf32, #tpu.memory_space<vmem>>, vector<1x4x16xf32>
    %42 = vector.shape_cast %41 : vector<1x4x16xf32> to vector<4x16xf32>
    %c0_44 = arith.constant 0 : index
    %c272 = arith.constant 272 : index
    %43 = vector.load %arg6[%c0_44, %c272] : memref<4x362xf32, #tpu.memory_space<vmem>>, vector<4x16xf32>
    tpu.vector_store %arg6[%c0_44, %c272], %42 {strides = array<i32>} : memref<4x362xf32, #tpu.memory_space<vmem>>, vector<4x16xf32>,
    %c0_45 = arith.constant 0 : index
    %c0_46 = arith.constant 0 : index
    %c224 = arith.constant 224 : index
    %44 = vector.load %arg1[%c0_45, %c0_46, %c224] : memref<1x4x256xf32, #tpu.memory_space<vmem>>, vector<1x4x16xf32>
    %45 = vector.shape_cast %44 : vector<1x4x16xf32> to vector<4x16xf32>
    %c0_47 = arith.constant 0 : index
    %c290 = arith.constant 290 : index
    %46 = vector.load %arg6[%c0_47, %c290] : memref<4x362xf32, #tpu.memory_space<vmem>>, vector<4x16xf32>
    tpu.vector_store %arg6[%c0_47, %c290], %45 {strides = array<i32>} : memref<4x362xf32, #tpu.memory_space<vmem>>, vector<4x16xf32>,
    %c0_48 = arith.constant 0 : index
    %c0_49 = arith.constant 0 : index
    %c240 = arith.constant 240 : index
    %47 = vector.load %arg1[%c0_48, %c0_49, %c240] : memref<1x4x256xf32, #tpu.memory_space<vmem>>, vector<1x4x16xf32>
    %48 = vector.shape_cast %47 : vector<1x4x16xf32> to vector<4x16xf32>
    %c0_50 = arith.constant 0 : index
    %c308 = arith.constant 308 : index
    %49 = vector.load %arg6[%c0_50, %c308] : memref<4x362xf32, #tpu.memory_space<vmem>>, vector<4x16xf32>
    tpu.vector_store %arg6[%c0_50, %c308], %48 {strides = array<i32>} : memref<4x362xf32, #tpu.memory_space<vmem>>, vector<4x16xf32>,
    %c0_51 = arith.constant 0 : index
    %c0_52 = arith.constant 0 : index
    %50 = vector.load %arg4[%c0_51, %c0_52] : memref<1x324xf32, #tpu.memory_space<vmem>>, vector<1x324xf32>
    %c0_53 = arith.constant 0 : index
    %c0_54 = arith.constant 0 : index
    %51 = vector.load %arg6[%c0_53, %c0_54] : memref<4x362xf32, #tpu.memory_space<vmem>>, vector<4x324xf32>
    %c0_55 = arith.constant 0 : index
    %c0_56 = arith.constant 0 : index
    %52 = vector.load %arg7[%c0_55, %c0_56] : memref<36x324xf32, #tpu.memory_space<vmem>>, vector<4x324xf32>
    tpu.vector_store %arg7[%c0_55, %c0_56], %51 {strides = array<i32>} : memref<36x324xf32, #tpu.memory_space<vmem>>, vector<4x324xf32>,
    %c0_57 = arith.constant 0 : index
    %c1 = arith.constant 1 : index
    %53 = vector.load %arg6[%c0_57, %c1] : memref<4x362xf32, #tpu.memory_space<vmem>>, vector<4x324xf32>
    %c4 = arith.constant 4 : index
    %c0_58 = arith.constant 0 : index
    %54 = vector.load %arg7[%c4, %c0_58] : memref<36x324xf32, #tpu.memory_space<vmem>>, vector<4x324xf32>
    tpu.vector_store %arg7[%c4, %c0_58], %53 {strides = array<i32>} : memref<36x324xf32, #tpu.memory_space<vmem>>, vector<4x324xf32>,
    %c0_59 = arith.constant 0 : index
    %c2 = arith.constant 2 : index
    %55 = vector.load %arg6[%c0_59, %c2] : memref<4x362xf32, #tpu.memory_space<vmem>>, vector<4x324xf32>
    %c8 = arith.constant 8 : index
    %c0_60 = arith.constant 0 : index
    %56 = vector.load %arg7[%c8, %c0_60] : memref<36x324xf32, #tpu.memory_space<vmem>>, vector<4x324xf32>
    tpu.vector_store %arg7[%c8, %c0_60], %55 {strides = array<i32>} : memref<36x324xf32, #tpu.memory_space<vmem>>, vector<4x324xf32>,
    %c0_61 = arith.constant 0 : index
    %c18 = arith.constant 18 : index
    %57 = vector.load %arg6[%c0_61, %c18] : memref<4x362xf32, #tpu.memory_space<vmem>>, vector<4x324xf32>
    %c12 = arith.constant 12 : index
    %c0_62 = arith.constant 0 : index
    %58 = vector.load %arg7[%c12, %c0_62] : memref<36x324xf32, #tpu.memory_space<vmem>>, vector<4x324xf32>
    tpu.vector_store %arg7[%c12, %c0_62], %57 {strides = array<i32>} : memref<36x324xf32, #tpu.memory_space<vmem>>, vector<4x324xf32>,
    %c0_63 = arith.constant 0 : index
    %c19 = arith.constant 19 : index
    %59 = vector.load %arg6[%c0_63, %c19] : memref<4x362xf32, #tpu.memory_space<vmem>>, vector<4x324xf32>
    %c16_64 = arith.constant 16 : index
    %c0_65 = arith.constant 0 : index
    %60 = vector.load %arg7[%c16_64, %c0_65] : memref<36x324xf32, #tpu.memory_space<vmem>>, vector<4x324xf32>
    tpu.vector_store %arg7[%c16_64, %c0_65], %59 {strides = array<i32>} : memref<36x324xf32, #tpu.memory_space<vmem>>, vector<4x324xf32>,
    %c0_66 = arith.constant 0 : index
    %c20 = arith.constant 20 : index
    %61 = vector.load %arg6[%c0_66, %c20] : memref<4x362xf32, #tpu.memory_space<vmem>>, vector<4x324xf32>
    %c20_67 = arith.constant 20 : index
    %c0_68 = arith.constant 0 : index
    %62 = vector.load %arg7[%c20_67, %c0_68] : memref<36x324xf32, #tpu.memory_space<vmem>>, vector<4x324xf32>
    tpu.vector_store %arg7[%c20_67, %c0_68], %61 {strides = array<i32>} : memref<36x324xf32, #tpu.memory_space<vmem>>, vector<4x324xf32>,
    %c0_69 = arith.constant 0 : index
    %c36 = arith.constant 36 : index
    %63 = vector.load %arg6[%c0_69, %c36] : memref<4x362xf32, #tpu.memory_space<vmem>>, vector<4x324xf32>
    %c24 = arith.constant 24 : index
    %c0_70 = arith.constant 0 : index
    %64 = vector.load %arg7[%c24, %c0_70] : memref<36x324xf32, #tpu.memory_space<vmem>>, vector<4x324xf32>
    tpu.vector_store %arg7[%c24, %c0_70], %63 {strides = array<i32>} : memref<36x324xf32, #tpu.memory_space<vmem>>, vector<4x324xf32>,
    %c0_71 = arith.constant 0 : index
    %c37 = arith.constant 37 : index
    %65 = vector.load %arg6[%c0_71, %c37] : memref<4x362xf32, #tpu.memory_space<vmem>>, vector<4x324xf32>
    %c28 = arith.constant 28 : index
    %c0_72 = arith.constant 0 : index
    %66 = vector.load %arg7[%c28, %c0_72] : memref<36x324xf32, #tpu.memory_space<vmem>>, vector<4x324xf32>
    tpu.vector_store %arg7[%c28, %c0_72], %65 {strides = array<i32>} : memref<36x324xf32, #tpu.memory_space<vmem>>, vector<4x324xf32>,
    %c0_73 = arith.constant 0 : index
    %c38_74 = arith.constant 38 : index
    %67 = vector.load %arg6[%c0_73, %c38_74] : memref<4x362xf32, #tpu.memory_space<vmem>>, vector<4x324xf32>
    %c32_75 = arith.constant 32 : index
    %c0_76 = arith.constant 0 : index
    %68 = vector.load %arg7[%c32_75, %c0_76] : memref<36x324xf32, #tpu.memory_space<vmem>>, vector<4x324xf32>
    tpu.vector_store %arg7[%c32_75, %c0_76], %67 {strides = array<i32>} : memref<36x324xf32, #tpu.memory_space<vmem>>, vector<4x324xf32>,
    %c0_77 = arith.constant 0 : index
    %c0_78 = arith.constant 0 : index
    %c0_79 = arith.constant 0 : index
    %69 = vector.load %arg2[%c0_77, %c0_78, %c0_79] : memref<4x4x36xf32, #tpu.memory_space<vmem>>, vector<1x4x36xf32>
    %70 = vector.shape_cast %69 : vector<1x4x36xf32> to vector<4x36xf32>
    %c0_80 = arith.constant 0 : index
    %c0_81 = arith.constant 0 : index
    %71 = vector.load %arg7[%c0_80, %c0_81] : memref<36x324xf32, #tpu.memory_space<vmem>>, vector<36x324xf32>
    %cst_82 = arith.constant dense<0.000000e+00> : vector<4x324xf32>
    %72 = tpu.matmul %70, %71, %cst_82 {dimension_numbers = #tpu.dot_dimension_numbers<[1], [0], [0], [1], [0, 0, 1, 1], [], []>} : vector<4x36xf32>, vector<36x324xf32>, vector<4x324xf32> -> vector<4x324xf32>
    %c0_83 = arith.constant 0 : index
    %c0_84 = arith.constant 0 : index
    %c0_85 = arith.constant 0 : index
    %73 = vector.load %arg3[%c0_83, %c0_84, %c0_85] : memref<4x4x1xf32, #tpu.memory_space<vmem>>, vector<1x4x1xf32>
    %74 = vector.shape_cast %73 : vector<1x4x1xf32> to vector<4x1xf32>
    %75 = vector.broadcast %74 : vector<4x1xf32> to vector<4x324xf32>
    %76 = arith.addf %72, %75 : vector<4x324xf32>
    %cst_86 = arith.constant 0.000000e+00 : f32
    %77 = vector.broadcast %cst_86 : f32 to vector<4x324xf32>
    %78 = arith.maximumf %76, %77 : vector<4x324xf32>
    %79 = vector.broadcast %50 : vector<1x324xf32> to vector<4x324xf32>
    %80 = arith.mulf %78, %79 : vector<4x324xf32>
    %c0_87 = arith.constant 0 : index
    %c19_88 = arith.constant 19 : index
    %81 = vector.load %arg6[%c0_87, %c19_88] : memref<4x362xf32, #tpu.memory_space<vmem>>, vector<4x324xf32>
    tpu.vector_store %arg6[%c0_87, %c19_88], %80 {strides = array<i32>} : memref<4x362xf32, #tpu.memory_space<vmem>>, vector<4x324xf32>,
    %c0_89 = arith.constant 0 : index
    %c0_90 = arith.constant 0 : index
    %82 = vector.load %arg6[%c0_89, %c0_90] : memref<4x362xf32, #tpu.memory_space<vmem>>, vector<4x324xf32>
    %c0_91 = arith.constant 0 : index
    %c0_92 = arith.constant 0 : index
    %83 = vector.load %arg7[%c0_91, %c0_92] : memref<36x324xf32, #tpu.memory_space<vmem>>, vector<4x324xf32>
    tpu.vector_store %arg7[%c0_91, %c0_92], %82 {strides = array<i32>} : memref<36x324xf32, #tpu.memory_space<vmem>>, vector<4x324xf32>,
    %c0_93 = arith.constant 0 : index
    %c1_94 = arith.constant 1 : index
    %84 = vector.load %arg6[%c0_93, %c1_94] : memref<4x362xf32, #tpu.memory_space<vmem>>, vector<4x324xf32>
    %c4_95 = arith.constant 4 : index
    %c0_96 = arith.constant 0 : index
    %85 = vector.load %arg7[%c4_95, %c0_96] : memref<36x324xf32, #tpu.memory_space<vmem>>, vector<4x324xf32>
    tpu.vector_store %arg7[%c4_95, %c0_96], %84 {strides = array<i32>} : memref<36x324xf32, #tpu.memory_space<vmem>>, vector<4x324xf32>,
    %c0_97 = arith.constant 0 : index
    %c2_98 = arith.constant 2 : index
    %86 = vector.load %arg6[%c0_97, %c2_98] : memref<4x362xf32, #tpu.memory_space<vmem>>, vector<4x324xf32>
    %c8_99 = arith.constant 8 : index
    %c0_100 = arith.constant 0 : index
    %87 = vector.load %arg7[%c8_99, %c0_100] : memref<36x324xf32, #tpu.memory_space<vmem>>, vector<4x324xf32>
    tpu.vector_store %arg7[%c8_99, %c0_100], %86 {strides = array<i32>} : memref<36x324xf32, #tpu.memory_space<vmem>>, vector<4x324xf32>,
    %c0_101 = arith.constant 0 : index
    %c18_102 = arith.constant 18 : index
    %88 = vector.load %arg6[%c0_101, %c18_102] : memref<4x362xf32, #tpu.memory_space<vmem>>, vector<4x324xf32>
    %c12_103 = arith.constant 12 : index
    %c0_104 = arith.constant 0 : index
    %89 = vector.load %arg7[%c12_103, %c0_104] : memref<36x324xf32, #tpu.memory_space<vmem>>, vector<4x324xf32>
    tpu.vector_store %arg7[%c12_103, %c0_104], %88 {strides = array<i32>} : memref<36x324xf32, #tpu.memory_space<vmem>>, vector<4x324xf32>,
    %c0_105 = arith.constant 0 : index
    %c19_106 = arith.constant 19 : index
    %90 = vector.load %arg6[%c0_105, %c19_106] : memref<4x362xf32, #tpu.memory_space<vmem>>, vector<4x324xf32>
    %c16_107 = arith.constant 16 : index
    %c0_108 = arith.constant 0 : index
    %91 = vector.load %arg7[%c16_107, %c0_108] : memref<36x324xf32, #tpu.memory_space<vmem>>, vector<4x324xf32>
    tpu.vector_store %arg7[%c16_107, %c0_108], %90 {strides = array<i32>} : memref<36x324xf32, #tpu.memory_space<vmem>>, vector<4x324xf32>,
    %c0_109 = arith.constant 0 : index
    %c20_110 = arith.constant 20 : index
    %92 = vector.load %arg6[%c0_109, %c20_110] : memref<4x362xf32, #tpu.memory_space<vmem>>, vector<4x324xf32>
    %c20_111 = arith.constant 20 : index
    %c0_112 = arith.constant 0 : index
    %93 = vector.load %arg7[%c20_111, %c0_112] : memref<36x324xf32, #tpu.memory_space<vmem>>, vector<4x324xf32>
    tpu.vector_store %arg7[%c20_111, %c0_112], %92 {strides = array<i32>} : memref<36x324xf32, #tpu.memory_space<vmem>>, vector<4x324xf32>,
    %c0_113 = arith.constant 0 : index
    %c36_114 = arith.constant 36 : index
    %94 = vector.load %arg6[%c0_113, %c36_114] : memref<4x362xf32, #tpu.memory_space<vmem>>, vector<4x324xf32>
    %c24_115 = arith.constant 24 : index
    %c0_116 = arith.constant 0 : index
    %95 = vector.load %arg7[%c24_115, %c0_116] : memref<36x324xf32, #tpu.memory_space<vmem>>, vector<4x324xf32>
    tpu.vector_store %arg7[%c24_115, %c0_116], %94 {strides = array<i32>} : memref<36x324xf32, #tpu.memory_space<vmem>>, vector<4x324xf32>,
    %c0_117 = arith.constant 0 : index
    %c37_118 = arith.constant 37 : index
    %96 = vector.load %arg6[%c0_117, %c37_118] : memref<4x362xf32, #tpu.memory_space<vmem>>, vector<4x324xf32>
    %c28_119 = arith.constant 28 : index
    %c0_120 = arith.constant 0 : index
    %97 = vector.load %arg7[%c28_119, %c0_120] : memref<36x324xf32, #tpu.memory_space<vmem>>, vector<4x324xf32>
    tpu.vector_store %arg7[%c28_119, %c0_120], %96 {strides = array<i32>} : memref<36x324xf32, #tpu.memory_space<vmem>>, vector<4x324xf32>,
    %c0_121 = arith.constant 0 : index
    %c38_122 = arith.constant 38 : index
    %98 = vector.load %arg6[%c0_121, %c38_122] : memref<4x362xf32, #tpu.memory_space<vmem>>, vector<4x324xf32>
    %c32_123 = arith.constant 32 : index
    %c0_124 = arith.constant 0 : index
    %99 = vector.load %arg7[%c32_123, %c0_124] : memref<36x324xf32, #tpu.memory_space<vmem>>, vector<4x324xf32>
    tpu.vector_store %arg7[%c32_123, %c0_124], %98 {strides = array<i32>} : memref<36x324xf32, #tpu.memory_space<vmem>>, vector<4x324xf32>,
    %c1_125 = arith.constant 1 : index
    %c0_126 = arith.constant 0 : index
    %c0_127 = arith.constant 0 : index
    %100 = vector.load %arg2[%c1_125, %c0_126, %c0_127] : memref<4x4x36xf32, #tpu.memory_space<vmem>>, vector<1x4x36xf32>
    %101 = vector.shape_cast %100 : vector<1x4x36xf32> to vector<4x36xf32>
    %c0_128 = arith.constant 0 : index
    %c0_129 = arith.constant 0 : index
    %102 = vector.load %arg7[%c0_128, %c0_129] : memref<36x324xf32, #tpu.memory_space<vmem>>, vector<36x324xf32>
    %cst_130 = arith.constant dense<0.000000e+00> : vector<4x324xf32>
    %103 = tpu.matmul %101, %102, %cst_130 {dimension_numbers = #tpu.dot_dimension_numbers<[1], [0], [0], [1], [0, 0, 1, 1], [], []>} : vector<4x36xf32>, vector<36x324xf32>, vector<4x324xf32> -> vector<4x324xf32>
    %c1_131 = arith.constant 1 : index
    %c0_132 = arith.constant 0 : index
    %c0_133 = arith.constant 0 : index
    %104 = vector.load %arg3[%c1_131, %c0_132, %c0_133] : memref<4x4x1xf32, #tpu.memory_space<vmem>>, vector<1x4x1xf32>
    %105 = vector.shape_cast %104 : vector<1x4x1xf32> to vector<4x1xf32>
    %106 = vector.broadcast %105 : vector<4x1xf32> to vector<4x324xf32>
    %107 = arith.addf %103, %106 : vector<4x324xf32>
    %cst_134 = arith.constant 0.000000e+00 : f32
    %108 = vector.broadcast %cst_134 : f32 to vector<4x324xf32>
    %109 = arith.maximumf %107, %108 : vector<4x324xf32>
    %110 = vector.broadcast %50 : vector<1x324xf32> to vector<4x324xf32>
    %111 = arith.mulf %109, %110 : vector<4x324xf32>
    %c0_135 = arith.constant 0 : index
    %c19_136 = arith.constant 19 : index
    %112 = vector.load %arg6[%c0_135, %c19_136] : memref<4x362xf32, #tpu.memory_space<vmem>>, vector<4x324xf32>
    tpu.vector_store %arg6[%c0_135, %c19_136], %111 {strides = array<i32>} : memref<4x362xf32, #tpu.memory_space<vmem>>, vector<4x324xf32>,
    %c0_137 = arith.constant 0 : index
    %c0_138 = arith.constant 0 : index
    %113 = vector.load %arg6[%c0_137, %c0_138] : memref<4x362xf32, #tpu.memory_space<vmem>>, vector<4x324xf32>
    %c0_139 = arith.constant 0 : index
    %c0_140 = arith.constant 0 : index
    %114 = vector.load %arg7[%c0_139, %c0_140] : memref<36x324xf32, #tpu.memory_space<vmem>>, vector<4x324xf32>
    tpu.vector_store %arg7[%c0_139, %c0_140], %113 {strides = array<i32>} : memref<36x324xf32, #tpu.memory_space<vmem>>, vector<4x324xf32>,
    %c0_141 = arith.constant 0 : index
    %c1_142 = arith.constant 1 : index
    %115 = vector.load %arg6[%c0_141, %c1_142] : memref<4x362xf32, #tpu.memory_space<vmem>>, vector<4x324xf32>
    %c4_143 = arith.constant 4 : index
    %c0_144 = arith.constant 0 : index
    %116 = vector.load %arg7[%c4_143, %c0_144] : memref<36x324xf32, #tpu.memory_space<vmem>>, vector<4x324xf32>
    tpu.vector_store %arg7[%c4_143, %c0_144], %115 {strides = array<i32>} : memref<36x324xf32, #tpu.memory_space<vmem>>, vector<4x324xf32>,
    %c0_145 = arith.constant 0 : index
    %c2_146 = arith.constant 2 : index
    %117 = vector.load %arg6[%c0_145, %c2_146] : memref<4x362xf32, #tpu.memory_space<vmem>>, vector<4x324xf32>
    %c8_147 = arith.constant 8 : index
    %c0_148 = arith.constant 0 : index
    %118 = vector.load %arg7[%c8_147, %c0_148] : memref<36x324xf32, #tpu.memory_space<vmem>>, vector<4x324xf32>
    tpu.vector_store %arg7[%c8_147, %c0_148], %117 {strides = array<i32>} : memref<36x324xf32, #tpu.memory_space<vmem>>, vector<4x324xf32>,
    %c0_149 = arith.constant 0 : index
    %c18_150 = arith.constant 18 : index
    %119 = vector.load %arg6[%c0_149, %c18_150] : memref<4x362xf32, #tpu.memory_space<vmem>>, vector<4x324xf32>
    %c12_151 = arith.constant 12 : index
    %c0_152 = arith.constant 0 : index
    %120 = vector.load %arg7[%c12_151, %c0_152] : memref<36x324xf32, #tpu.memory_space<vmem>>, vector<4x324xf32>
    tpu.vector_store %arg7[%c12_151, %c0_152], %119 {strides = array<i32>} : memref<36x324xf32, #tpu.memory_space<vmem>>, vector<4x324xf32>,
    %c0_153 = arith.constant 0 : index
    %c19_154 = arith.constant 19 : index
    %121 = vector.load %arg6[%c0_153, %c19_154] : memref<4x362xf32, #tpu.memory_space<vmem>>, vector<4x324xf32>
    %c16_155 = arith.constant 16 : index
    %c0_156 = arith.constant 0 : index
    %122 = vector.load %arg7[%c16_155, %c0_156] : memref<36x324xf32, #tpu.memory_space<vmem>>, vector<4x324xf32>
    tpu.vector_store %arg7[%c16_155, %c0_156], %121 {strides = array<i32>} : memref<36x324xf32, #tpu.memory_space<vmem>>, vector<4x324xf32>,
    %c0_157 = arith.constant 0 : index
    %c20_158 = arith.constant 20 : index
    %123 = vector.load %arg6[%c0_157, %c20_158] : memref<4x362xf32, #tpu.memory_space<vmem>>, vector<4x324xf32>
    %c20_159 = arith.constant 20 : index
    %c0_160 = arith.constant 0 : index
    %124 = vector.load %arg7[%c20_159, %c0_160] : memref<36x324xf32, #tpu.memory_space<vmem>>, vector<4x324xf32>
    tpu.vector_store %arg7[%c20_159, %c0_160], %123 {strides = array<i32>} : memref<36x324xf32, #tpu.memory_space<vmem>>, vector<4x324xf32>,
    %c0_161 = arith.constant 0 : index
    %c36_162 = arith.constant 36 : index
    %125 = vector.load %arg6[%c0_161, %c36_162] : memref<4x362xf32, #tpu.memory_space<vmem>>, vector<4x324xf32>
    %c24_163 = arith.constant 24 : index
    %c0_164 = arith.constant 0 : index
    %126 = vector.load %arg7[%c24_163, %c0_164] : memref<36x324xf32, #tpu.memory_space<vmem>>, vector<4x324xf32>
    tpu.vector_store %arg7[%c24_163, %c0_164], %125 {strides = array<i32>} : memref<36x324xf32, #tpu.memory_space<vmem>>, vector<4x324xf32>,
    %c0_165 = arith.constant 0 : index
    %c37_166 = arith.constant 37 : index
    %127 = vector.load %arg6[%c0_165, %c37_166] : memref<4x362xf32, #tpu.memory_space<vmem>>, vector<4x324xf32>
    %c28_167 = arith.constant 28 : index
    %c0_168 = arith.constant 0 : index
    %128 = vector.load %arg7[%c28_167, %c0_168] : memref<36x324xf32, #tpu.memory_space<vmem>>, vector<4x324xf32>
    tpu.vector_store %arg7[%c28_167, %c0_168], %127 {strides = array<i32>} : memref<36x324xf32, #tpu.memory_space<vmem>>, vector<4x324xf32>,
    %c0_169 = arith.constant 0 : index
    %c38_170 = arith.constant 38 : index
    %129 = vector.load %arg6[%c0_169, %c38_170] : memref<4x362xf32, #tpu.memory_space<vmem>>, vector<4x324xf32>
    %c32_171 = arith.constant 32 : index
    %c0_172 = arith.constant 0 : index
    %130 = vector.load %arg7[%c32_171, %c0_172] : memref<36x324xf32, #tpu.memory_space<vmem>>, vector<4x324xf32>
    tpu.vector_store %arg7[%c32_171, %c0_172], %129 {strides = array<i32>} : memref<36x324xf32, #tpu.memory_space<vmem>>, vector<4x324xf32>,
    %c2_173 = arith.constant 2 : index
    %c0_174 = arith.constant 0 : index
    %c0_175 = arith.constant 0 : index
    %131 = vector.load %arg2[%c2_173, %c0_174, %c0_175] : memref<4x4x36xf32, #tpu.memory_space<vmem>>, vector<1x4x36xf32>
    %132 = vector.shape_cast %131 : vector<1x4x36xf32> to vector<4x36xf32>
    %c0_176 = arith.constant 0 : index
    %c0_177 = arith.constant 0 : index
    %133 = vector.load %arg7[%c0_176, %c0_177] : memref<36x324xf32, #tpu.memory_space<vmem>>, vector<36x324xf32>
    %cst_178 = arith.constant dense<0.000000e+00> : vector<4x324xf32>
    %134 = tpu.matmul %132, %133, %cst_178 {dimension_numbers = #tpu.dot_dimension_numbers<[1], [0], [0], [1], [0, 0, 1, 1], [], []>} : vector<4x36xf32>, vector<36x324xf32>, vector<4x324xf32> -> vector<4x324xf32>
    %c2_179 = arith.constant 2 : index
    %c0_180 = arith.constant 0 : index
    %c0_181 = arith.constant 0 : index
    %135 = vector.load %arg3[%c2_179, %c0_180, %c0_181] : memref<4x4x1xf32, #tpu.memory_space<vmem>>, vector<1x4x1xf32>
    %136 = vector.shape_cast %135 : vector<1x4x1xf32> to vector<4x1xf32>
    %137 = vector.broadcast %136 : vector<4x1xf32> to vector<4x324xf32>
    %138 = arith.addf %134, %137 : vector<4x324xf32>
    %cst_182 = arith.constant 0.000000e+00 : f32
    %139 = vector.broadcast %cst_182 : f32 to vector<4x324xf32>
    %140 = arith.maximumf %138, %139 : vector<4x324xf32>
    %141 = vector.broadcast %50 : vector<1x324xf32> to vector<4x324xf32>
    %142 = arith.mulf %140, %141 : vector<4x324xf32>
    %c0_183 = arith.constant 0 : index
    %c19_184 = arith.constant 19 : index
    %143 = vector.load %arg6[%c0_183, %c19_184] : memref<4x362xf32, #tpu.memory_space<vmem>>, vector<4x324xf32>
    tpu.vector_store %arg6[%c0_183, %c19_184], %142 {strides = array<i32>} : memref<4x362xf32, #tpu.memory_space<vmem>>, vector<4x324xf32>,
    %c0_185 = arith.constant 0 : index
    %c0_186 = arith.constant 0 : index
    %144 = vector.load %arg6[%c0_185, %c0_186] : memref<4x362xf32, #tpu.memory_space<vmem>>, vector<4x324xf32>
    %c0_187 = arith.constant 0 : index
    %c0_188 = arith.constant 0 : index
    %145 = vector.load %arg7[%c0_187, %c0_188] : memref<36x324xf32, #tpu.memory_space<vmem>>, vector<4x324xf32>
    tpu.vector_store %arg7[%c0_187, %c0_188], %144 {strides = array<i32>} : memref<36x324xf32, #tpu.memory_space<vmem>>, vector<4x324xf32>,
    %c0_189 = arith.constant 0 : index
    %c1_190 = arith.constant 1 : index
    %146 = vector.load %arg6[%c0_189, %c1_190] : memref<4x362xf32, #tpu.memory_space<vmem>>, vector<4x324xf32>
    %c4_191 = arith.constant 4 : index
    %c0_192 = arith.constant 0 : index
    %147 = vector.load %arg7[%c4_191, %c0_192] : memref<36x324xf32, #tpu.memory_space<vmem>>, vector<4x324xf32>
    tpu.vector_store %arg7[%c4_191, %c0_192], %146 {strides = array<i32>} : memref<36x324xf32, #tpu.memory_space<vmem>>, vector<4x324xf32>,
    %c0_193 = arith.constant 0 : index
    %c2_194 = arith.constant 2 : index
    %148 = vector.load %arg6[%c0_193, %c2_194] : memref<4x362xf32, #tpu.memory_space<vmem>>, vector<4x324xf32>
    %c8_195 = arith.constant 8 : index
    %c0_196 = arith.constant 0 : index
    %149 = vector.load %arg7[%c8_195, %c0_196] : memref<36x324xf32, #tpu.memory_space<vmem>>, vector<4x324xf32>
    tpu.vector_store %arg7[%c8_195, %c0_196], %148 {strides = array<i32>} : memref<36x324xf32, #tpu.memory_space<vmem>>, vector<4x324xf32>,
    %c0_197 = arith.constant 0 : index
    %c18_198 = arith.constant 18 : index
    %150 = vector.load %arg6[%c0_197, %c18_198] : memref<4x362xf32, #tpu.memory_space<vmem>>, vector<4x324xf32>
    %c12_199 = arith.constant 12 : index
    %c0_200 = arith.constant 0 : index
    %151 = vector.load %arg7[%c12_199, %c0_200] : memref<36x324xf32, #tpu.memory_space<vmem>>, vector<4x324xf32>
    tpu.vector_store %arg7[%c12_199, %c0_200], %150 {strides = array<i32>} : memref<36x324xf32, #tpu.memory_space<vmem>>, vector<4x324xf32>,
    %c0_201 = arith.constant 0 : index
    %c19_202 = arith.constant 19 : index
    %152 = vector.load %arg6[%c0_201, %c19_202] : memref<4x362xf32, #tpu.memory_space<vmem>>, vector<4x324xf32>
    %c16_203 = arith.constant 16 : index
    %c0_204 = arith.constant 0 : index
    %153 = vector.load %arg7[%c16_203, %c0_204] : memref<36x324xf32, #tpu.memory_space<vmem>>, vector<4x324xf32>
    tpu.vector_store %arg7[%c16_203, %c0_204], %152 {strides = array<i32>} : memref<36x324xf32, #tpu.memory_space<vmem>>, vector<4x324xf32>,
    %c0_205 = arith.constant 0 : index
    %c20_206 = arith.constant 20 : index
    %154 = vector.load %arg6[%c0_205, %c20_206] : memref<4x362xf32, #tpu.memory_space<vmem>>, vector<4x324xf32>
    %c20_207 = arith.constant 20 : index
    %c0_208 = arith.constant 0 : index
    %155 = vector.load %arg7[%c20_207, %c0_208] : memref<36x324xf32, #tpu.memory_space<vmem>>, vector<4x324xf32>
    tpu.vector_store %arg7[%c20_207, %c0_208], %154 {strides = array<i32>} : memref<36x324xf32, #tpu.memory_space<vmem>>, vector<4x324xf32>,
    %c0_209 = arith.constant 0 : index
    %c36_210 = arith.constant 36 : index
    %156 = vector.load %arg6[%c0_209, %c36_210] : memref<4x362xf32, #tpu.memory_space<vmem>>, vector<4x324xf32>
    %c24_211 = arith.constant 24 : index
    %c0_212 = arith.constant 0 : index
    %157 = vector.load %arg7[%c24_211, %c0_212] : memref<36x324xf32, #tpu.memory_space<vmem>>, vector<4x324xf32>
    tpu.vector_store %arg7[%c24_211, %c0_212], %156 {strides = array<i32>} : memref<36x324xf32, #tpu.memory_space<vmem>>, vector<4x324xf32>,
    %c0_213 = arith.constant 0 : index
    %c37_214 = arith.constant 37 : index
    %158 = vector.load %arg6[%c0_213, %c37_214] : memref<4x362xf32, #tpu.memory_space<vmem>>, vector<4x324xf32>
    %c28_215 = arith.constant 28 : index
    %c0_216 = arith.constant 0 : index
    %159 = vector.load %arg7[%c28_215, %c0_216] : memref<36x324xf32, #tpu.memory_space<vmem>>, vector<4x324xf32>
    tpu.vector_store %arg7[%c28_215, %c0_216], %158 {strides = array<i32>} : memref<36x324xf32, #tpu.memory_space<vmem>>, vector<4x324xf32>,
    %c0_217 = arith.constant 0 : index
    %c38_218 = arith.constant 38 : index
    %160 = vector.load %arg6[%c0_217, %c38_218] : memref<4x362xf32, #tpu.memory_space<vmem>>, vector<4x324xf32>
    %c32_219 = arith.constant 32 : index
    %c0_220 = arith.constant 0 : index
    %161 = vector.load %arg7[%c32_219, %c0_220] : memref<36x324xf32, #tpu.memory_space<vmem>>, vector<4x324xf32>
    tpu.vector_store %arg7[%c32_219, %c0_220], %160 {strides = array<i32>} : memref<36x324xf32, #tpu.memory_space<vmem>>, vector<4x324xf32>,
    %c3 = arith.constant 3 : index
    %c0_221 = arith.constant 0 : index
    %c0_222 = arith.constant 0 : index
    %162 = vector.load %arg2[%c3, %c0_221, %c0_222] : memref<4x4x36xf32, #tpu.memory_space<vmem>>, vector<1x4x36xf32>
    %163 = vector.shape_cast %162 : vector<1x4x36xf32> to vector<4x36xf32>
    %c0_223 = arith.constant 0 : index
    %c0_224 = arith.constant 0 : index
    %164 = vector.load %arg7[%c0_223, %c0_224] : memref<36x324xf32, #tpu.memory_space<vmem>>, vector<36x324xf32>
    %cst_225 = arith.constant dense<0.000000e+00> : vector<4x324xf32>
    %165 = tpu.matmul %163, %164, %cst_225 {dimension_numbers = #tpu.dot_dimension_numbers<[1], [0], [0], [1], [0, 0, 1, 1], [], []>} : vector<4x36xf32>, vector<36x324xf32>, vector<4x324xf32> -> vector<4x324xf32>
    %c3_226 = arith.constant 3 : index
    %c0_227 = arith.constant 0 : index
    %c0_228 = arith.constant 0 : index
    %166 = vector.load %arg3[%c3_226, %c0_227, %c0_228] : memref<4x4x1xf32, #tpu.memory_space<vmem>>, vector<1x4x1xf32>
    %167 = vector.shape_cast %166 : vector<1x4x1xf32> to vector<4x1xf32>
    %168 = vector.broadcast %167 : vector<4x1xf32> to vector<4x324xf32>
    %169 = arith.addf %165, %168 : vector<4x324xf32>
    %cst_229 = arith.constant 0.000000e+00 : f32
    %170 = vector.broadcast %cst_229 : f32 to vector<4x324xf32>
    %171 = arith.maximumf %169, %170 : vector<4x324xf32>
    %172 = vector.broadcast %50 : vector<1x324xf32> to vector<4x324xf32>
    %173 = arith.mulf %171, %172 : vector<4x324xf32>
    %c0_230 = arith.constant 0 : index
    %c19_231 = arith.constant 19 : index
    %174 = vector.load %arg6[%c0_230, %c19_231] : memref<4x362xf32, #tpu.memory_space<vmem>>, vector<4x324xf32>
    tpu.vector_store %arg6[%c0_230, %c19_231], %173 {strides = array<i32>} : memref<4x362xf32, #tpu.memory_space<vmem>>, vector<4x324xf32>,
    %c0_232 = arith.constant 0 : index
    %c38_233 = arith.constant 38 : index
    %175 = vector.load %arg6[%c0_232, %c38_233] : memref<4x362xf32, #tpu.memory_space<vmem>>, vector<4x16xf32>
    %c0_234 = arith.constant 0 : index
    %c0_235 = arith.constant 0 : index
    %c0_236 = arith.constant 0 : index
    %176 = vector.load %arg5[%c0_234, %c0_235, %c0_236] : memref<1x4x256xf32, #tpu.memory_space<vmem>>, vector<1x4x16xf32>
    %177 = vector.shape_cast %176 : vector<1x4x16xf32> to vector<4x16xf32>
    %178 = vector.shape_cast %175 : vector<4x16xf32> to vector<1x4x16xf32>
    tpu.vector_store %arg5[%c0_234, %c0_235, %c0_236], %178 {strides = array<i32>} : memref<1x4x256xf32, #tpu.memory_space<vmem>>, vector<1x4x16xf32>,
    %c0_237 = arith.constant 0 : index
    %c56_238 = arith.constant 56 : index
    %179 = vector.load %arg6[%c0_237, %c56_238] : memref<4x362xf32, #tpu.memory_space<vmem>>, vector<4x16xf32>
    %c0_239 = arith.constant 0 : index
    %c0_240 = arith.constant 0 : index
    %c16_241 = arith.constant 16 : index
    %180 = vector.load %arg5[%c0_239, %c0_240, %c16_241] : memref<1x4x256xf32, #tpu.memory_space<vmem>>, vector<1x4x16xf32>
    %181 = vector.shape_cast %180 : vector<1x4x16xf32> to vector<4x16xf32>
    %182 = vector.shape_cast %179 : vector<4x16xf32> to vector<1x4x16xf32>
    tpu.vector_store %arg5[%c0_239, %c0_240, %c16_241], %182 {strides = array<i32>} : memref<1x4x256xf32, #tpu.memory_space<vmem>>, vector<1x4x16xf32>,
    %c0_242 = arith.constant 0 : index
    %c74_243 = arith.constant 74 : index
    %183 = vector.load %arg6[%c0_242, %c74_243] : memref<4x362xf32, #tpu.memory_space<vmem>>, vector<4x16xf32>
    %c0_244 = arith.constant 0 : index
    %c0_245 = arith.constant 0 : index
    %c32_246 = arith.constant 32 : index
    %184 = vector.load %arg5[%c0_244, %c0_245, %c32_246] : memref<1x4x256xf32, #tpu.memory_space<vmem>>, vector<1x4x16xf32>
    %185 = vector.shape_cast %184 : vector<1x4x16xf32> to vector<4x16xf32>
    %186 = vector.shape_cast %183 : vector<4x16xf32> to vector<1x4x16xf32>
    tpu.vector_store %arg5[%c0_244, %c0_245, %c32_246], %186 {strides = array<i32>} : memref<1x4x256xf32, #tpu.memory_space<vmem>>, vector<1x4x16xf32>,
    %c0_247 = arith.constant 0 : index
    %c92_248 = arith.constant 92 : index
    %187 = vector.load %arg6[%c0_247, %c92_248] : memref<4x362xf32, #tpu.memory_space<vmem>>, vector<4x16xf32>
    %c0_249 = arith.constant 0 : index
    %c0_250 = arith.constant 0 : index
    %c48_251 = arith.constant 48 : index
    %188 = vector.load %arg5[%c0_249, %c0_250, %c48_251] : memref<1x4x256xf32, #tpu.memory_space<vmem>>, vector<1x4x16xf32>
    %189 = vector.shape_cast %188 : vector<1x4x16xf32> to vector<4x16xf32>
    %190 = vector.shape_cast %187 : vector<4x16xf32> to vector<1x4x16xf32>
    tpu.vector_store %arg5[%c0_249, %c0_250, %c48_251], %190 {strides = array<i32>} : memref<1x4x256xf32, #tpu.memory_space<vmem>>, vector<1x4x16xf32>,
    %c0_252 = arith.constant 0 : index
    %c110_253 = arith.constant 110 : index
    %191 = vector.load %arg6[%c0_252, %c110_253] : memref<4x362xf32, #tpu.memory_space<vmem>>, vector<4x16xf32>
    %c0_254 = arith.constant 0 : index
    %c0_255 = arith.constant 0 : index
    %c64_256 = arith.constant 64 : index
    %192 = vector.load %arg5[%c0_254, %c0_255, %c64_256] : memref<1x4x256xf32, #tpu.memory_space<vmem>>, vector<1x4x16xf32>
    %193 = vector.shape_cast %192 : vector<1x4x16xf32> to vector<4x16xf32>
    %194 = vector.shape_cast %191 : vector<4x16xf32> to vector<1x4x16xf32>
    tpu.vector_store %arg5[%c0_254, %c0_255, %c64_256], %194 {strides = array<i32>} : memref<1x4x256xf32, #tpu.memory_space<vmem>>, vector<1x4x16xf32>,
    %c0_257 = arith.constant 0 : index
    %c128_258 = arith.constant 128 : index
    %195 = vector.load %arg6[%c0_257, %c128_258] : memref<4x362xf32, #tpu.memory_space<vmem>>, vector<4x16xf32>
    %c0_259 = arith.constant 0 : index
    %c0_260 = arith.constant 0 : index
    %c80_261 = arith.constant 80 : index
    %196 = vector.load %arg5[%c0_259, %c0_260, %c80_261] : memref<1x4x256xf32, #tpu.memory_space<vmem>>, vector<1x4x16xf32>
    %197 = vector.shape_cast %196 : vector<1x4x16xf32> to vector<4x16xf32>
    %198 = vector.shape_cast %195 : vector<4x16xf32> to vector<1x4x16xf32>
    tpu.vector_store %arg5[%c0_259, %c0_260, %c80_261], %198 {strides = array<i32>} : memref<1x4x256xf32, #tpu.memory_space<vmem>>, vector<1x4x16xf32>,
    %c0_262 = arith.constant 0 : index
    %c146_263 = arith.constant 146 : index
    %199 = vector.load %arg6[%c0_262, %c146_263] : memref<4x362xf32, #tpu.memory_space<vmem>>, vector<4x16xf32>
    %c0_264 = arith.constant 0 : index
    %c0_265 = arith.constant 0 : index
    %c96_266 = arith.constant 96 : index
    %200 = vector.load %arg5[%c0_264, %c0_265, %c96_266] : memref<1x4x256xf32, #tpu.memory_space<vmem>>, vector<1x4x16xf32>
    %201 = vector.shape_cast %200 : vector<1x4x16xf32> to vector<4x16xf32>
    %202 = vector.shape_cast %199 : vector<4x16xf32> to vector<1x4x16xf32>
    tpu.vector_store %arg5[%c0_264, %c0_265, %c96_266], %202 {strides = array<i32>} : memref<1x4x256xf32, #tpu.memory_space<vmem>>, vector<1x4x16xf32>,
    %c0_267 = arith.constant 0 : index
    %c164_268 = arith.constant 164 : index
    %203 = vector.load %arg6[%c0_267, %c164_268] : memref<4x362xf32, #tpu.memory_space<vmem>>, vector<4x16xf32>
    %c0_269 = arith.constant 0 : index
    %c0_270 = arith.constant 0 : index
    %c112_271 = arith.constant 112 : index
    %204 = vector.load %arg5[%c0_269, %c0_270, %c112_271] : memref<1x4x256xf32, #tpu.memory_space<vmem>>, vector<1x4x16xf32>
    %205 = vector.shape_cast %204 : vector<1x4x16xf32> to vector<4x16xf32>
    %206 = vector.shape_cast %203 : vector<4x16xf32> to vector<1x4x16xf32>
    tpu.vector_store %arg5[%c0_269, %c0_270, %c112_271], %206 {strides = array<i32>} : memref<1x4x256xf32, #tpu.memory_space<vmem>>, vector<1x4x16xf32>,
    %c0_272 = arith.constant 0 : index
    %c182_273 = arith.constant 182 : index
    %207 = vector.load %arg6[%c0_272, %c182_273] : memref<4x362xf32, #tpu.memory_space<vmem>>, vector<4x16xf32>
    %c0_274 = arith.constant 0 : index
    %c0_275 = arith.constant 0 : index
    %c128_276 = arith.constant 128 : index
    %208 = vector.load %arg5[%c0_274, %c0_275, %c128_276] : memref<1x4x256xf32, #tpu.memory_space<vmem>>, vector<1x4x16xf32>
    %209 = vector.shape_cast %208 : vector<1x4x16xf32> to vector<4x16xf32>
    %210 = vector.shape_cast %207 : vector<4x16xf32> to vector<1x4x16xf32>
    tpu.vector_store %arg5[%c0_274, %c0_275, %c128_276], %210 {strides = array<i32>} : memref<1x4x256xf32, #tpu.memory_space<vmem>>, vector<1x4x16xf32>,
    %c0_277 = arith.constant 0 : index
    %c200_278 = arith.constant 200 : index
    %211 = vector.load %arg6[%c0_277, %c200_278] : memref<4x362xf32, #tpu.memory_space<vmem>>, vector<4x16xf32>
    %c0_279 = arith.constant 0 : index
    %c0_280 = arith.constant 0 : index
    %c144_281 = arith.constant 144 : index
    %212 = vector.load %arg5[%c0_279, %c0_280, %c144_281] : memref<1x4x256xf32, #tpu.memory_space<vmem>>, vector<1x4x16xf32>
    %213 = vector.shape_cast %212 : vector<1x4x16xf32> to vector<4x16xf32>
    %214 = vector.shape_cast %211 : vector<4x16xf32> to vector<1x4x16xf32>
    tpu.vector_store %arg5[%c0_279, %c0_280, %c144_281], %214 {strides = array<i32>} : memref<1x4x256xf32, #tpu.memory_space<vmem>>, vector<1x4x16xf32>,
    %c0_282 = arith.constant 0 : index
    %c218_283 = arith.constant 218 : index
    %215 = vector.load %arg6[%c0_282, %c218_283] : memref<4x362xf32, #tpu.memory_space<vmem>>, vector<4x16xf32>
    %c0_284 = arith.constant 0 : index
    %c0_285 = arith.constant 0 : index
    %c160_286 = arith.constant 160 : index
    %216 = vector.load %arg5[%c0_284, %c0_285, %c160_286] : memref<1x4x256xf32, #tpu.memory_space<vmem>>, vector<1x4x16xf32>
    %217 = vector.shape_cast %216 : vector<1x4x16xf32> to vector<4x16xf32>
    %218 = vector.shape_cast %215 : vector<4x16xf32> to vector<1x4x16xf32>
    tpu.vector_store %arg5[%c0_284, %c0_285, %c160_286], %218 {strides = array<i32>} : memref<1x4x256xf32, #tpu.memory_space<vmem>>, vector<1x4x16xf32>,
    %c0_287 = arith.constant 0 : index
    %c236_288 = arith.constant 236 : index
    %219 = vector.load %arg6[%c0_287, %c236_288] : memref<4x362xf32, #tpu.memory_space<vmem>>, vector<4x16xf32>
    %c0_289 = arith.constant 0 : index
    %c0_290 = arith.constant 0 : index
    %c176_291 = arith.constant 176 : index
    %220 = vector.load %arg5[%c0_289, %c0_290, %c176_291] : memref<1x4x256xf32, #tpu.memory_space<vmem>>, vector<1x4x16xf32>
    %221 = vector.shape_cast %220 : vector<1x4x16xf32> to vector<4x16xf32>
    %222 = vector.shape_cast %219 : vector<4x16xf32> to vector<1x4x16xf32>
    tpu.vector_store %arg5[%c0_289, %c0_290, %c176_291], %222 {strides = array<i32>} : memref<1x4x256xf32, #tpu.memory_space<vmem>>, vector<1x4x16xf32>,
    %c0_292 = arith.constant 0 : index
    %c254_293 = arith.constant 254 : index
    %223 = vector.load %arg6[%c0_292, %c254_293] : memref<4x362xf32, #tpu.memory_space<vmem>>, vector<4x16xf32>
    %c0_294 = arith.constant 0 : index
    %c0_295 = arith.constant 0 : index
    %c192_296 = arith.constant 192 : index
    %224 = vector.load %arg5[%c0_294, %c0_295, %c192_296] : memref<1x4x256xf32, #tpu.memory_space<vmem>>, vector<1x4x16xf32>
    %225 = vector.shape_cast %224 : vector<1x4x16xf32> to vector<4x16xf32>
    %226 = vector.shape_cast %223 : vector<4x16xf32> to vector<1x4x16xf32>
    tpu.vector_store %arg5[%c0_294, %c0_295, %c192_296], %226 {strides = array<i32>} : memref<1x4x256xf32, #tpu.memory_space<vmem>>, vector<1x4x16xf32>,
    %c0_297 = arith.constant 0 : index
    %c272_298 = arith.constant 272 : index
    %227 = vector.load %arg6[%c0_297, %c272_298] : memref<4x362xf32, #tpu.memory_space<vmem>>, vector<4x16xf32>
    %c0_299 = arith.constant 0 : index
    %c0_300 = arith.constant 0 : index
    %c208_301 = arith.constant 208 : index
    %228 = vector.load %arg5[%c0_299, %c0_300, %c208_301] : memref<1x4x256xf32, #tpu.memory_space<vmem>>, vector<1x4x16xf32>
    %229 = vector.shape_cast %228 : vector<1x4x16xf32> to vector<4x16xf32>
    %230 = vector.shape_cast %227 : vector<4x16xf32> to vector<1x4x16xf32>
    tpu.vector_store %arg5[%c0_299, %c0_300, %c208_301], %230 {strides = array<i32>} : memref<1x4x256xf32, #tpu.memory_space<vmem>>, vector<1x4x16xf32>,
    %c0_302 = arith.constant 0 : index
    %c290_303 = arith.constant 290 : index
    %231 = vector.load %arg6[%c0_302, %c290_303] : memref<4x362xf32, #tpu.memory_space<vmem>>, vector<4x16xf32>
    %c0_304 = arith.constant 0 : index
    %c0_305 = arith.constant 0 : index
    %c224_306 = arith.constant 224 : index
    %232 = vector.load %arg5[%c0_304, %c0_305, %c224_306] : memref<1x4x256xf32, #tpu.memory_space<vmem>>, vector<1x4x16xf32>
    %233 = vector.shape_cast %232 : vector<1x4x16xf32> to vector<4x16xf32>
    %234 = vector.shape_cast %231 : vector<4x16xf32> to vector<1x4x16xf32>
    tpu.vector_store %arg5[%c0_304, %c0_305, %c224_306], %234 {strides = array<i32>} : memref<1x4x256xf32, #tpu.memory_space<vmem>>, vector<1x4x16xf32>,
    %c0_307 = arith.constant 0 : index
    %c308_308 = arith.constant 308 : index
    %235 = vector.load %arg6[%c0_307, %c308_308] : memref<4x362xf32, #tpu.memory_space<vmem>>, vector<4x16xf32>
    %c0_309 = arith.constant 0 : index
    %c0_310 = arith.constant 0 : index
    %c240_311 = arith.constant 240 : index
    %236 = vector.load %arg5[%c0_309, %c0_310, %c240_311] : memref<1x4x256xf32, #tpu.memory_space<vmem>>, vector<1x4x16xf32>
    %237 = vector.shape_cast %236 : vector<1x4x16xf32> to vector<4x16xf32>
    %238 = vector.shape_cast %235 : vector<4x16xf32> to vector<1x4x16xf32>
    tpu.vector_store %arg5[%c0_309, %c0_310, %c240_311], %238 {strides = array<i32>} : memref<1x4x256xf32, #tpu.memory_space<vmem>>, vector<1x4x16xf32>,
    return
  }
  func.func @transform_0(%arg0: i32) -> (i32, i32, i32) {
    %c0_i32 = arith.constant 0 : i32
    %c0_i32_0 = arith.constant 0 : i32
    %c0_i32_1 = arith.constant 0 : i32
    return %arg0, %c0_i32, %c0_i32_0 : i32, i32, i32
  }
  func.func @transform_1(%arg0: i32) -> (i32, i32, i32) {
    %c0_i32 = arith.constant 0 : i32
    %c0_i32_0 = arith.constant 0 : i32
    %c0_i32_1 = arith.constant 0 : i32
    %c0_i32_2 = arith.constant 0 : i32
    return %c0_i32, %c0_i32_0, %c0_i32_1 : i32, i32, i32
  }
  func.func @transform_2(%arg0: i32) -> (i32, i32, i32) {
    %c0_i32 = arith.constant 0 : i32
    %c0_i32_0 = arith.constant 0 : i32
    %c0_i32_1 = arith.constant 0 : i32
    %c0_i32_2 = arith.constant 0 : i32
    return %c0_i32, %c0_i32_0, %c0_i32_1 : i32, i32, i32
  }
  func.func @transform_3(%arg0: i32) -> (i32, i32) {
    %c0_i32 = arith.constant 0 : i32
    %c0_i32_0 = arith.constant 0 : i32
    %c0_i32_1 = arith.constant 0 : i32
    return %c0_i32, %c0_i32_0 : i32, i32
  }
  func.func @transform_4(%arg0: i32) -> (i32, i32, i32) {
    %c0_i32 = arith.constant 0 : i32
    %c0_i32_0 = arith.constant 0 : i32
    %c0_i32_1 = arith.constant 0 : i32
    return %arg0, %c0_i32, %c0_i32_0 : i32, i32, i32
  }
}

</mosaic_0001>

<bundles_post_ra>
// kernel: bridge_forward.1
= control target key start
LH: loop header
LB: loop body
LE: loop exit
PB: predicated region body
PF: predicated region fallthrough
CT: control target
= control target key end

     0   :  { %s1981_s15 = smov 0   ;;  %s2431_s0 = inlined_call_operand.vmem [shape: f32[2,4,256], index: 0, kind: input, shape index: {}]   ;;  %s2432_s1 = inlined_call_operand.vmem [shape: f32[4,4,36], index: 1, kind: input, shape index: {}]   ;;  %s2433_s2 = inlined_call_operand.vmem [shape: f32[4,4,1], index: 2, kind: input, shape index: {}]   ;;  %s2434_s3 = inlined_call_operand.vmem [shape: f32[1,324], index: 3, kind: input, shape index: {}]   ;;  %s2435_s4 = inlined_call_operand.vmem [shape: f32[2,4,256], index: 4, kind: output, shape index: {}]  }
   0x1 LB: > { %s1821_s16 = sadd.s32 4294967295, %s1917_s15   ;;  %p1825_p0 = scmp.ge.s32.totalorder %s1917_s15, 1  ;;  %s1917_s15 = sphi %s1981_s15, %s14_s15  }
   0x2   : > { %p162_p1 = scmp.lt.s32.totalorder %s1917_s15, 3 }
   0x4   : > { %p163_p2 = pnand %p1825_p0, %p162_p1 }
   0x5   : > { %p188_p3 = scmp.lt.s32.totalorder (!%p163_p2), %s1821_s16, 1  ;;  %s1919_s21 = smov (!%p163_p2), 48  }
   0x6   : > { %166 = sbr.rel (%p163_p2) target bundleno = 2169 (0x879), region = 36  ;;  %s1920_s22 = smov (!%p163_p2), 52  }
   0x7   : > { %s1921_s23 = smov (!%p163_p2), 56   ;;  %s1922_s24 = smov (!%p163_p2), 50  }
   0x8   : > { %s1923_s25 = smov (!%p163_p2), 54   ;;  %s1924_s26 = smov (!%p163_p2), 62  }
   0x9   : > { %s1925_s27 = smov (!%p163_p2), 58   ;;  %s1926_s28 = smov (!%p163_p2), 38  }
   0xa   : > { %s1927_s29 = smov (!%p163_p2), 60   ;;  %s1928_s30 = smov (!%p163_p2), 40  }
   0xb   : > { %s2459_s16 = smov (!%p188_p3, %s1821_s16), 1  ;;  %s1929_s5 = smov 42   ;;  %vm199_vm0 = vcmask 863232   ;;  %v1935_v16 = vmov 0.0   ;;  %vm2437_vm1 = vcmask 125952   ;;  %vm248_vm2 = vcmask 273552  }
   0xc   : > { %s1862_s17 = sshll.u32 %s2459_s16, 3  ;;  %s1930_s6 = smov 64   ;;  %198 = vst [vmem:[#allocation2] sm:$0xff] %v1935_v16  ;;  %vm255_vm3 = vcmask 421152   ;;  %vm262_vm4 = vcmask 568752   ;;  %vm269_vm5 = vcmask 716352  }
   0xd   : > { %s1997_s20 = scalar_lea.vmem %s2431_s0, %s1862_s17  ;;  %s1931_s7 = smov 44   ;;  %200 = vst.msk [vmem:[#allocation2 + $0x8] sm:$0xf] %vm199_vm0, %v1935_v16  ;;  %vm293_vm6 = vcmask 1044464   ;;  %vm294_vm7 = vcmask 113668   ;;  %vm276_vm8 = vcmask 863952  }
   0xe   : > { %v236_v0 = vld [vmem:[%s1997_s20] sm:$0xf]  ;;  %v264_v2 = vld [vmem:[%s1997_s20 + $0x4] sm:$0xf]  ;;  %s1932_s8 = smov 66   ;;  %s1933_s9 = smov 46   ;;  %vm295_vm11 = vmor %vm294_vm7, %vm293_vm6 }
   0xf   : > { %v250_v1 = vld [vmem:[%s1997_s20] sm:$0xf]  ;;  %238 = vrot.lane.b32.xlu0 %v236_v0, %s1919_s21  ;;  %266 = vrot.lane.b32.xlu2 %v264_v2, %s1921_s23  ;;  %v257_v4 = vld [vmem:[%s1997_s20 + $0x4] sm:$0xf]  ;;  %s1934_s10 = smov 68   ;;  %vm290_vm9 = vcmask 506880  }
  0x10   : > { %252 = vrot.lane.b32.xlu1 %v250_v1, %s1920_s22  ;;  %v243_v3 = vld [vmem:[%s1997_s20] sm:$0xf]  ;;  %v285_v5 = vld [vmem:[%s1997_s20 + $0x4] sm:$0xf]  ;;  %vm283_vm10 = vcmask 1011552   ;;  %vm206_vm12 = vcmask 437552   ;;  %s2406_s22 = scalar_lea.vmem %s2435_s4, %s1862_s17 }
  0x11   : > { %v271_v6 = vld [vmem:[%s1997_s20 + $0x4] sm:$0xf]  ;;  %v201_v7 = vld [vmem:[%s1997_s20] sm:$0xf]  ;;  %vm2436_vm13 = vcmask 257152   ;;  %vm213_vm14 = vcmask 585152  }
  0x12   : > { %v278_v8 = vld [vmem:[%s1997_s20 + $0x4] sm:$0xf]  ;;  %v208_v9 = vld [vmem:[%s1997_s20] sm:$0xf]  ;;  %vm220_vm15 = vcmask 732752   ;;  %vm227_vm0 = vcmask 880352  }
  0x13   : > { %v215_v10 = vld [vmem:[%s1997_s20] sm:$0xf]  ;;  %v297_v11 = vld [vmem:[%s1997_s20 + $0x4] sm:$0xf]  ;;  %s1936_s11 = smov 127   ;;  %s1937_s12 = smov 126  }
  0x14   : > { %v222_v12 = vld [vmem:[%s1997_s20] sm:$0xf]  ;;  %v304_v13 = vld [vmem:[%s1997_s20 + $0x4] sm:$0xf]  ;;  %s1938_s13 = smov 110   ;;  %s1939_s14 = smov 109  }
  0x15   : > { %v229_v14 = vld [vmem:[%s1997_s20] sm:$0xf]  ;;  %v311_v15 = vld [vmem:[%s1997_s20 + $0x4] sm:$0xf]  ;;  %s1940_s18 = smov 108   ;;  %s1941_s19 = smov 92  }
  0x16   : > { %s1942_s20 = smov 91   ;;  %s1943_s21 = smov 90   ;;  %vm361_vm6 = vcmask 556036   ;;  %vm353_vm7 = vcmask 1039360  }
  0x17   : > { %245 = vrot.lane.b32.xlu0 %v243_v3, %s1922_s24  ;;  %287 = vrot.lane.b32.xlu2 %v285_v5, %s1924_s26 }
  0x18   : > { %259 = vrot.lane.b32.xlu1 %v257_v4, %s1923_s25 }
  0x1f   : > { %273 = vrot.lane.b32.xlu0 %v271_v6, %s1925_s27  ;;  %280 = vrot.lane.b32.xlu2 %v278_v8, %s1927_s29 }
  0x20   : > { %203 = vrot.lane.b32.xlu1 %v201_v7, %s1926_s28 }
  0x27   : > { %210 = vrot.lane.b32.xlu0 %v208_v9, %s1928_s30  ;;  %299 = vrot.lane.b32.xlu2 %v297_v11, %s1930_s6  ;;  %s1945_s30 = smov 19  }
  0x28   : > { %217 = vrot.lane.b32.xlu1 %v215_v10, %s1929_s5  ;;  %s1952_s5 = smov 82  }
  0x2f   : > { %224 = vrot.lane.b32.xlu0 %v222_v12, %s1931_s7  ;;  %231 = vrot.lane.b32.xlu2 %v229_v14, %s1933_s9  ;;  %s1953_s7 = smov 80  }
  0x30   : > { %306 = vrot.lane.b32.xlu1 %v304_v13, %s1932_s8 }
  0x37   : > { %313 = vrot.lane.b32.xlu0 %v311_v15, %s1934_s10 }
  0x69   : > { %v267_v17 = vpop.permute.xlu2 %266 }
  0x71   : > { %v288_v18 = vpop.permute.xlu2 %287 }
  0x72   : > { %v289_v24 = vrot.slane %v288_v18, 4 }
  0x74   : > { %v291_v27 = vsel %vm290_vm9, %v289_v24, %v288_v18  ;;  %vm379_vm9 = vcmask 1031168  }
  0x79   : > { %v281_v21 = vpop.permute.xlu2 %280 }
  0x81   : > { %v239_v19 = vpop.permute.xlu0 %238  ;;  %v300_v28 = vpop.permute.xlu2 %299 }
  0x82   : > { %v253_v20 = vpop.permute.xlu1 %252  ;;  %242 = vst.msk [vmem:[#allocation2 + $0x4] sm:$0xf] %vm2437_vm1, %v239_v19 }
  0x89   : > { %v246_v22 = vpop.permute.xlu0 %245  ;;  %v232_v31 = vpop.permute.xlu2 %231 }
  0x8a   : > { %v260_v23 = vpop.permute.xlu1 %259  ;;  %249 = vst.msk [vmem:[#allocation2 + $0x4] sm:$0xf] %vm248_vm2, %v246_v22  ;;  %vm234_vm2 = vcmask 1027952  }
  0x8b   : > { %256 = vst.msk [vmem:[#allocation2 + $0x4] sm:$0xf] %vm255_vm3, %v253_v20  ;;  %vm309_vm3 = vcmask 404752  }
  0x8c   : > { %263 = vst.msk [vmem:[#allocation2 + $0x4] sm:$0xf] %vm262_vm4, %v260_v23  ;;  %vm316_vm4 = vcmask 552352  }
  0x8d   : > { %270 = vst.msk [vmem:[#allocation2 + $0x4] sm:$0xf] %vm269_vm5, %v267_v17  ;;  %vm334_vm5 = vcmask 551936  }
  0x91   : > { %v274_v25 = vpop.permute.xlu0 %273 }
  0x92   : > { %v204_v26 = vpop.permute.xlu1 %203  ;;  %277 = vst.msk [vmem:[#allocation2 + $0x4] sm:$0xf] %vm276_vm8, %v274_v25  ;;  %vm405_vm8 = vcmask 900096  }
  0x93   : > { %284 = vst.msk [vmem:[#allocation2 + $0x4] sm:$0xf] %vm283_vm10, %v281_v21  ;;  %vm430_vm10 = vcmask 891904  }
  0x94   : > { %296 = vst.msk [vmem:[#allocation2 + $0x4] sm:$0xff] %vm295_vm11, %v291_v27  ;;  %vm456_vm11 = vcmask 883712  }
  0x95   : > { %207 = vst.msk [vmem:[#allocation2] sm:$0xf] %vm206_vm12, %v204_v26  ;;  %vm481_vm12 = vcmask 752640  }
  0x96   : > { %303 = vst.msk [vmem:[#allocation2 + $0x8] sm:$0xf] %vm2436_vm13, %v300_v28  ;;  %vm660_vm13 = vcmask 154624  }
  0x99   : > { %v211_v29 = vpop.permute.xlu0 %210 }
  0x9a   : > { %v218_v30 = vpop.permute.xlu1 %217  ;;  %214 = vst.msk [vmem:[#allocation2] sm:$0xf] %vm213_vm14, %v211_v29  ;;  %vm567_vm14 = vcmask 1043456  }
  0x9b   : > { %221 = vst.msk [vmem:[#allocation2] sm:$0xf] %vm220_vm15, %v218_v30  ;;  %vm507_vm15 = vcmask 744448  }
  0xa1   : > { %v225_v32 = vpop.permute.xlu0 %224 }
  0xa2   : > { %v307_v33 = vpop.permute.xlu1 %306  ;;  %228 = vst.msk [vmem:[#allocation2] sm:$0xf] %vm227_vm0, %v225_v32  ;;  %vm2439_vm0 = vcmask 736256  }
  0xa3   : > { %235 = vst.msk [vmem:[#allocation2] sm:$0xf] %vm234_vm2, %v232_v31  ;;  %vm2438_vm2 = vcmask 293888  }
  0xa4   : > { %310 = vst.msk [vmem:[#allocation2 + $0x8] sm:$0xf] %vm309_vm3, %v307_v33  ;;  %vm665_vm3 = vcmask 1043608  }
  0xa9   : > { %v314_v34 = vpop.permute.xlu0 %313 }
  0xaa   : > { %v2022_v35 = vld [vmem:[#allocation2] sm:$0xff]  ;;  %317 = vst.msk [vmem:[#allocation2 + $0x8] sm:$0xf] %vm316_vm4, %v314_v34  ;;  %vm666_vm4 = vcmask 1047556  }
  0xab   : > { %323 = vst [vmem:[#allocation1] ss:$2 sm:$0xff] %v2022_v35  ;;  %vm2123_vm1 = vmor %vm666_vm4, %vm665_vm3  ;;  %vm2442_vm3 = vcmask 293888  }
  0xac   : > { %vm2443_vm4 = vmmov %vm2442_vm3 }
  0xb1   : > { %v320_v38 = vld [vmem:[#allocation2 + $0x8] sm:$0xf] }
  0xb2   : > { %v326_v36 = vld.sshfl [vmem:[#allocation1] sm:$0xff pattern:$0x75316420]  ;;  %v327_v37 = vld.sshfl [vmem:[#allocation1 + $0x8] sm:$0xff pattern:$0x75316420] }
  0xb3   : > { %341 = vst [vmem:[#allocation1 + $0x1] ss:$2 sm:$0xff] %v2022_v35  ;;  %v337_v42 = vld [vmem:[#allocation2 + $0x8] sm:$0xf] }
  0xb4   : > { %332 = vst [vmem:[#allocation3] sm:$0xf] %v326_v36  ;;  %v364_v46 = vld [vmem:[#allocation2 + $0x8] sm:$0xf] }
  0xb5   : > { %333 = vst [vmem:[#allocation3 + $0x8] sm:$0xf] %v327_v37  ;;  %v389_v50 = vld [vmem:[#allocation2 + $0x8] sm:$0xf]  ;;  %v557_v37 = vld [vmem:[%s2433_s2] sm:$0xf] }
  0xb6   : > { %325 = vst [vmem:[#allocation1 + $0x10] ss:$2 sm:$0xff] %v320_v38  ;;  %v415_v54 = vld [vmem:[#allocation2 + $0x8] sm:$0xf] }
  0xb7   : > { %v440_v58 = vld [vmem:[#allocation2 + $0x8] sm:$0xf] }
  0xb8   : > { %v466_v62 = vld [vmem:[#allocation2 + $0x8] sm:$0xf] }
  0xb9   : > { %v491_v2 = vld [vmem:[#allocation2 + $0x8] sm:$0xf] }
  0xba   : > { %v2026_v39 = vld.sshfl [vmem:[#allocation1] sm:$0xff pattern:$0x75316420]  ;;  %v345_v40 = vld.sshfl [vmem:[#allocation1 + $0x8] sm:$0xff pattern:$0x75316420] }
  0xbb   : > { %367 = vst [vmem:[#allocation1] ss:$2 sm:$0xff] %v2022_v35  ;;  %349 = vrot.lane.b32.xlu2 %v345_v40, %s1936_s11  ;;  %v517_v4 = vld [vmem:[#allocation2 + $0x8] sm:$0xf] }
  0xbd   : > { %v328_v41 = vld.sshfl [vmem:[#allocation1 + $0x10] sm:$0xff pattern:$0x75316420] }
  0xbe   : > { %343 = vst [vmem:[#allocation1 + $0x11] ss:$2 sm:$0xff] %v337_v42 }
  0xbf   : > { %335 = vst.msk [vmem:[#allocation3 + $0x10] sm:$0xf] %vm334_vm5, %v328_v41 }
  0xc2   : > { %v2031_v43 = vld.sshfl [vmem:[#allocation1] sm:$0xff pattern:$0x75316420]  ;;  %v371_v44 = vld.sshfl [vmem:[#allocation1 + $0x8] sm:$0xff pattern:$0x75316420] }
  0xc3   : > { %393 = vst [vmem:[#allocation1 + $0x1] ss:$2 sm:$0xff] %v2022_v35  ;;  %375 = vrot.lane.b32.xlu2 %v371_v44, %s1937_s12 }
  0xc5   : > { %v346_v45 = vld.sshfl [vmem:[#allocation1 + $0x10] sm:$0xff pattern:$0x75316420] }
  0xc6   : > { %369 = vst [vmem:[#allocation1 + $0x10] ss:$2 sm:$0xff] %v364_v46  ;;  %351 = vrot.lane.b32.xlu0 %v346_v45, %s1936_s11 }
  0xca   : > { %v396_v47 = vld.sshfl [vmem:[#allocation1] sm:$0xff pattern:$0x75316420]  ;;  %v397_v48 = vld.sshfl [vmem:[#allocation1 + $0x8] sm:$0xff pattern:$0x75316420] }
  0xcb   : > { %418 = vst [vmem:[#allocation1] ss:$2 sm:$0xff] %v2022_v35  ;;  %401 = vrot.lane.b32.xlu1 %v397_v48, %s1938_s13 }
  0xcd   : > { %v372_v49 = vld.sshfl [vmem:[#allocation1 + $0x10] sm:$0xff pattern:$0x75316420] }
  0xce   : > { %395 = vst [vmem:[#allocation1 + $0x11] ss:$2 sm:$0xff] %v389_v50  ;;  %377 = vrot.lane.b32.xlu0 %v372_v49, %s1937_s12  ;;  %v541_v50 = vld [vmem:[%s2432_s1] sm:$0xf] }
  0xd2   : > { %v421_v51 = vld.sshfl [vmem:[#allocation1] sm:$0xff pattern:$0x75316420]  ;;  %v422_v52 = vld.sshfl [vmem:[#allocation1 + $0x8] sm:$0xff pattern:$0x75316420] }
  0xd3   : > { %444 = vst [vmem:[#allocation1 + $0x1] ss:$2 sm:$0xff] %v2022_v35 }
  0xd5   : > { %v398_v53 = vld.sshfl [vmem:[#allocation1 + $0x10] sm:$0xff pattern:$0x75316420] }
  0xd6   : > { %420 = vst [vmem:[#allocation1 + $0x10] ss:$2 sm:$0xff] %v415_v54  ;;  %403 = vrot.lane.b32.xlu2 %v398_v53, %s1938_s13  ;;  %424 = vrot.lane.b32.xlu0 %v421_v51, %s1939_s14 }
  0xda   : > { %v447_v55 = vld.sshfl [vmem:[#allocation1] sm:$0xff pattern:$0x75316420]  ;;  %v448_v56 = vld.sshfl [vmem:[#allocation1 + $0x8] sm:$0xff pattern:$0x75316420] }
  0xdb   : > { %469 = vst [vmem:[#allocation1] ss:$2 sm:$0xff] %v2022_v35  ;;  %452 = vrot.lane.b32.xlu1 %v448_v56, %s1940_s18 }
  0xdd   : > { %v423_v57 = vld.sshfl [vmem:[#allocation1 + $0x10] sm:$0xff pattern:$0x75316420] }
  0xde   : > { %446 = vst [vmem:[#allocation1 + $0x11] ss:$2 sm:$0xff] %v440_v58  ;;  %426 = vrot.lane.b32.xlu2 %v422_v52, %s1939_s14  ;;  %428 = vrot.lane.b32.xlu0 %v423_v57, %s1939_s14 }
  0xe2   : > { %v472_v59 = vld.sshfl [vmem:[#allocation1] sm:$0xff pattern:$0x75316420]  ;;  %v473_v60 = vld.sshfl [vmem:[#allocation1 + $0x8] sm:$0xff pattern:$0x75316420] }
  0xe3   : > { %495 = vst [vmem:[#allocation1 + $0x1] ss:$2 sm:$0xff] %v2022_v35  ;;  %450 = vrot.lane.b32.xlu1 %v447_v55, %s1940_s18 }
  0xe5   : > { %v449_v61 = vld.sshfl [vmem:[#allocation1 + $0x10] sm:$0xff pattern:$0x75316420] }
  0xe6   : > { %471 = vst [vmem:[#allocation1 + $0x10] ss:$2 sm:$0xff] %v466_v62  ;;  %454 = vrot.lane.b32.xlu2 %v449_v61, %s1940_s18  ;;  %477 = vrot.lane.b32.xlu0 %v473_v60, %s1941_s19 }
  0xea   : > { %v498_v63 = vld.sshfl [vmem:[#allocation1] sm:$0xff pattern:$0x75316420]  ;;  %v499_v0 = vld.sshfl [vmem:[#allocation1 + $0x8] sm:$0xff pattern:$0x75316420] }
  0xeb   : > { %520 = vst [vmem:[#allocation1] ss:$2 sm:$0xff] %v2022_v35 }
  0xed   : > { %v474_v1 = vld.sshfl [vmem:[#allocation1 + $0x10] sm:$0xff pattern:$0x75316420] }
  0xee   : > { %497 = vst [vmem:[#allocation1 + $0x11] ss:$2 sm:$0xff] %v491_v2  ;;  %475 = vrot.lane.b32.xlu0 %v472_v59, %s1941_s19  ;;  %503 = vrot.lane.b32.xlu2 %v499_v0, %s1942_s20 }
  0xef   : > { %479 = vrot.lane.b32.xlu1 %v474_v1, %s1941_s19 }
  0xf2   : > { %v524_v6 = vld.sshfl [vmem:[#allocation1 + $0x8] sm:$0xff pattern:$0x75316420]  ;;  %v523_v7 = vld.sshfl [vmem:[#allocation1] sm:$0xff pattern:$0x75316420] }
  0xf5   : > { %v500_v3 = vld.sshfl [vmem:[#allocation1 + $0x10] sm:$0xff pattern:$0x75316420] }
  0xf6   : > { %522 = vst [vmem:[#allocation1 + $0x10] ss:$2 sm:$0xff] %v517_v4  ;;  %505 = vrot.lane.b32.xlu0 %v500_v3, %s1942_s20  ;;  %v318_v3 = vld [vmem:[%s2434_s3] sm:$0x7] }
  0xf7   : > { %501 = vrot.lane.b32.xlu1 %v498_v63, %s1942_s20 }
  0xfd   : > { %v525_v5 = vld.sshfl [vmem:[#allocation1 + $0x10] sm:$0xff pattern:$0x75316420] }
  0xfe   : > { %530 = vrot.lane.b32.xlu2 %v525_v5, %s1943_s21  ;;  %347 = vrot.lane.b32.xlu0 %v2026_v39, %s1936_s11  ;;  %v1944_v39 = vmov 0  }
  0xff   : > { %528 = vrot.lane.b32.xlu1 %v524_v6, %s1943_s21  ;;  %1910 = vset.pattern.permute.xlu0 %v1944_v39  ;;  %v2111_v6 = vperm.slane %v318_v3, 2 }
 0x100   : > { %1909 = vset.pattern.permute.xlu1 %v1944_v39 }
 0x106   : > { %399 = vrot.lane.b32.xlu2 %v396_v47, %s1938_s13 }
 0x107   : > { %526 = vrot.lane.b32.xlu1 %v523_v7, %s1943_s21 }
 0x10f   : > { %373 = vrot.lane.b32.xlu1 %v2031_v43, %s1937_s12 }
 0x115   : > { %v2064_v8 = vpop.permute.xlu2 %349 }
 0x117   : > { %560 = vperm.xlu1 %1909, %v557_v37  }
 0x11d   : > { %v2066_v9 = vpop.permute.xlu2 %375 }
 0x130   : > { %v404_v10 = vpop.permute.xlu2 %403 }
 0x131   : > { %413 = vst.msk [vmem:[#allocation3 + $0x28] sm:$0xf0] %vm361_vm6, %v404_v10 }
 0x138   : > { %v352_v11 = vpop.permute.xlu0 %351  ;;  %v427_v12 = vpop.permute.xlu2 %426 }
 0x139   : > { %v355_v13 = vsel %vm353_vm7, %v2064_v8, %v352_v11  ;;  %362 = vst.msk [vmem:[#allocation3 + $0x10] sm:$0xf0] %vm361_vm6, %v352_v11 }
 0x13a   : > { %360 = vst [vmem:[#allocation3 + $0x8] sm:$0xf0] %v355_v13 }
 0x13d   : > { %v402_v14 = vpop.permute.xlu1 %401 }
 0x13e   : > { %v407_v15 = vsel %vm405_vm8, %v402_v14, %v404_v10 }
 0x13f   : > { %412 = vst [vmem:[#allocation3 + $0x20] sm:$0xf0] %v407_v15 }
 0x140   : > { %v378_v16 = vpop.permute.xlu0 %377  ;;  %v455_v17 = vpop.permute.xlu2 %454  ;;  %v544_v51 = vld [vmem:[#allocation3 + $0x10] sm:$0xff] }
 0x141   : > { %v381_v18 = vsel %vm379_vm9, %v2066_v9, %v378_v16  ;;  %387 = vst.msk [vmem:[#allocation3 + $0x28] sm:$0xf] %vm334_vm5, %v378_v16  ;;  %v543_v61 = vld [vmem:[#allocation3 + $0x8] sm:$0xff]  ;;  %v2118_v16 = vperm.slane %v318_v3, 0 }
 0x142   : > { %386 = vst [vmem:[#allocation3 + $0x20] sm:$0xf] %v381_v18 }
 0x143   : > { %464 = vst.msk [vmem:[#allocation3 + $0x40] sm:$0xf0] %vm361_vm6, %v455_v17 }
 0x148   : > { %v425_v19 = vpop.permute.xlu0 %424  ;;  %v504_v23 = vpop.permute.xlu2 %503  ;;  %v547_v49 = vld [vmem:[#allocation3 + $0x28] sm:$0xff] }
 0x149   : > { %v431_v20 = vsel %vm430_vm10, %v425_v19, %v427_v12  ;;  %v546_v57 = vld [vmem:[#allocation3 + $0x20] sm:$0xff] }
 0x14a   : > { %436 = vst [vmem:[#allocation3 + $0x30] sm:$0xf] %v431_v20 }
 0x14d   : > { %v453_v21 = vpop.permute.xlu1 %452 }
 0x14e   : > { %v458_v22 = vsel %vm456_vm11, %v453_v21, %v455_v17 }
 0x14f   : > { %463 = vst [vmem:[#allocation3 + $0x38] sm:$0xf0] %v458_v22 }
 0x150   : > { %v429_v24 = vpop.permute.xlu0 %428 }
 0x151   : > { %v432_v25 = vsel %vm430_vm10, %v427_v12, %v429_v24  ;;  %438 = vst.msk [vmem:[#allocation3 + $0x40] sm:$0xf] %vm334_vm5, %v429_v24  ;;  %v2115_v12 = vperm.slane %v318_v3, 1 }
 0x152   : > { %437 = vst [vmem:[#allocation3 + $0x38] sm:$0xf] %v432_v25 }
 0x155   : > { %v451_v26 = vpop.permute.xlu1 %450 }
 0x156   : > { %v457_v27 = vsel %vm456_vm11, %v451_v26, %v453_v21 }
 0x157   : > { %462 = vst [vmem:[#allocation3 + $0x30] sm:$0xf0] %v457_v27 }
 0x158   : > { %v531_v28 = vpop.permute.xlu2 %530  ;;  %v478_v29 = vpop.permute.xlu0 %477  ;;  %v550_v48 = vld [vmem:[#allocation3 + $0x40] sm:$0xff] }
 0x159   : > { %540 = vst.msk [vmem:[#allocation3 + $0x70] sm:$0xf] %vm334_vm5, %v531_v28  ;;  %v549_v56 = vld [vmem:[#allocation3 + $0x38] sm:$0xff] }
 0x15e   : > { %v548_v63 = vld [vmem:[#allocation3 + $0x30] sm:$0xff] }
 0x160   : > { %v400_v30 = vpop.permute.xlu2 %399  ;;  %v476_v31 = vpop.permute.xlu0 %475  ;;  %v556_v32 = vld [vmem:[#allocation3 + $0x70] sm:$0xf] }
 0x161   : > { %v406_v33 = vsel %vm405_vm8, %v400_v30, %v402_v14  ;;  %v482_v34 = vsel %vm481_vm12, %v476_v31, %v478_v29  ;;  %1834 = vmatpush.msk.msra.mxu2 %vm567_vm14, %v556_v32  ;;  %v480_v35 = vpop.permute.xlu1 %479 }
 0x162   : > { %411 = vst [vmem:[#allocation3 + $0x18] sm:$0xf0] %v406_v33  ;;  %v483_v36 = vsel %vm481_vm12, %v478_v29, %v480_v35 }
 0x163   : > { %487 = vst [vmem:[#allocation3 + $0x48] sm:$0xf] %v482_v34 }
 0x164   : > { %488 = vst [vmem:[#allocation3 + $0x50] sm:$0xf] %v483_v36 }
 0x165   : > { %489 = vst.msk [vmem:[#allocation3 + $0x58] sm:$0xf] %vm334_vm5, %v480_v35 }
 0x168   : > { %v506_v38 = vpop.permute.xlu0 %505 }
 0x169   : > { %v509_v40 = vsel %vm507_vm15, %v504_v23, %v506_v38  ;;  %515 = vst.msk [vmem:[#allocation3 + $0x58] sm:$0xf0] %vm361_vm6, %v506_v38  ;;  %v502_v41 = vpop.permute.xlu1 %501 }
 0x16a   : > { %514 = vst [vmem:[#allocation3 + $0x50] sm:$0xf0] %v509_v40  ;;  %v508_v42 = vsel %vm507_vm15, %v502_v41, %v504_v23 }
 0x16b   : > { %513 = vst [vmem:[#allocation3 + $0x48] sm:$0xf0] %v508_v42 }
 0x170   : > { %v348_v43 = vpop.permute.xlu0 %347  ;;  %v553_v44 = vld [vmem:[#allocation3 + $0x58] sm:$0xff] }
 0x171   : > { %v354_v45 = vsel %vm353_vm7, %v348_v43, %v2064_v8  ;;  %v529_v46 = vpop.permute.xlu1 %528  ;;  %629 = vmatpush.msra.mxu2 %v553_v44  ;;  %v552_v55 = vld [vmem:[#allocation3 + $0x50] sm:$0xff] }
 0x172   : > { %359 = vst [vmem:[#allocation3] sm:$0xf0] %v354_v45  ;;  %v534_v47 = vsel %vm2439_vm0, %v529_v46, %v531_v28  ;;  %v551_v62 = vld [vmem:[#allocation3 + $0x48] sm:$0xff] }
 0x173   : > { %539 = vst [vmem:[#allocation3 + $0x68] sm:$0xf] %v534_v47  ;;  %630 = vmatpush.msra.mxu2 %v550_v48 }
 0x175   : > { %631 = vmatpush.msra.mxu2 %v547_v49 }
 0x177   : > { %632 = vmatpush.msra.mxu2 %v544_v51 }
 0x178   : > { %1835 = vmatmul.msk.f32.vlgmr.msra.gmra.mxu2 %vm2438_vm2, %v541_v50 }
 0x179   : > { %v527_v52 = vpop.permute.xlu1 %526  ;;  %v542_v1 = vld [vmem:[#allocation3] sm:$0xff] }
 0x17a   : > { %v533_v53 = vsel %vm2439_vm0, %v527_v52, %v529_v46  ;;  %v555_v54 = vld [vmem:[#allocation3 + $0x68] sm:$0xf] }
 0x17b   : > { %538 = vst [vmem:[#allocation3 + $0x60] sm:$0xf] %v533_v53  ;;  %1832 = vmatpush.msk.msra.mxu1 %vm567_vm14, %v555_v54 }
 0x17d   : > { %609 = vmatpush.msra.mxu1 %v552_v55 }
 0x17f   : > { %610 = vmatpush.msra.mxu1 %v549_v56 }
 0x181   : > { %611 = vmatpush.msra.mxu1 %v546_v57  ;;  %v374_v58 = vpop.permute.xlu1 %373 }
 0x182   : > { %v380_v59 = vsel %vm379_vm9, %v374_v58, %v2066_v9  ;;  %v554_v60 = vld [vmem:[#allocation3 + $0x60] sm:$0xf] }
 0x183   : > { %385 = vst [vmem:[#allocation3 + $0x18] sm:$0xf] %v380_v59  ;;  %1830 = vmatpush.msk.msra.mxu0 %vm567_vm14, %v554_v60  ;;  %612 = vmatpush.msra.mxu1 %v543_v61 }
 0x184   : > { %1833 = vmatmul.msk.f32.vlgmr.msra.gmra.mxu1 %vm2438_vm2, %v541_v50 }
 0x185   : > { %589 = vmatpush.msra.mxu0 %v551_v62 }
 0x187   : > { %590 = vmatpush.msra.mxu0 %v548_v63  ;;  %v1837_v63 = vld [vmem:[%s2433_s2 + $0x4] sm:$0xf] }
 0x189   : > { %v561_v2 = vpop.permute.xlu1 %560 }
 0x18a   : > { %v545_v0 = vld [vmem:[#allocation3 + $0x18] sm:$0xff] }
 0x18b   : > { %591 = vmatpush.msra.mxu0 %v545_v0 }
 0x18d   : > { %592 = vmatpush.msra.mxu0 %v542_v1 }
 0x18e   : > { %1831 = vmatmul.msk.f32.vlgmr.msra.gmra.mxu0 %vm2438_vm2, %v541_v50  ;;  %vm669_vm2 = vcmask 707584  }
 0x1fb   : > { %v634_v4 = vpop.f32.mrf.mxu2 }
 0x1fc   : > { %v635_v5 = vadd.f32 %v634_v4, %v561_v2 }
 0x1fe   : > { %v639_v7 = vmax.f32 %v635_v5, 0.0 }
 0x200   : > { %v649_v8 = vmul.f32 %v2111_v6, %v639_v7 }
 0x201   : > { %v614_v9 = vpop.f32.mrf.mxu1 }
 0x202   : > { %657 = vrot.lane.b32.xlu0 %v649_v8, %s1945_s30  ;;  %v615_v10 = vadd.f32 %v614_v9, %v561_v2 }
 0x204   : > { %v638_v11 = vmax.f32 %v615_v10, 0.0 }
 0x206   : > { %v648_v14 = vmul.f32 %v2115_v12, %v638_v11 }
 0x208   : > { %v653_v18 = vrot.slane %v648_v14, 4 }
 0x20b   : > { %v594_v13 = vpop.f32.mrf.mxu0 }
 0x20c   : > { %v595_v15 = vadd.f32 %v594_v13, %v561_v2 }
 0x20e   : > { %v637_v17 = vmax.f32 %v595_v15, 0.0 }
 0x210   : > { %v647_v19 = vmul.f32 %v2118_v16, %v637_v17 }
 0x212   : > { %v654_v20 = vsel %vm567_vm14, %v647_v19, %v653_v18 }
 0x213   : > { %655 = vrot.lane.b32.xlu2 %v654_v20, %s1945_s30 }
 0x26d   : > { %v656_v21 = vpop.permute.xlu2 %655 }
 0x26e   : > { %v659_v23 = vrot.slane %v656_v21, 4 }
 0x270   : > { %v661_v24 = vsel %vm660_vm13, %v659_v23, %v656_v21 }
 0x271   : > { %668 = vst.msk [vmem:[#allocation2] sm:$0xff] %vm2123_vm1, %v661_v24 }
 0x274   : > { %v658_v25 = vpop.permute.xlu0 %657 }
 0x275   : > { %v662_v26 = vsel %vm660_vm13, %v659_v23, %v658_v25 }
 0x276   : > { %670 = vst.msk [vmem:[#allocation2 + $0x8] sm:$0xf] %vm669_vm2, %v662_v26 }
 0x278   : > { %v2132_v27 = vld [vmem:[#allocation2] sm:$0xff] }
 0x279   : > { %675 = vst [vmem:[#allocation1] ss:$2 sm:$0xff] %v2132_v27 }
 0x27d   : > { %v672_v28 = vld [vmem:[#allocation2 + $0x8] sm:$0xf] }
 0x27e   : > { %677 = vst [vmem:[#allocation1 + $0x10] ss:$2 sm:$0xff] %v672_v28  ;;  %v688_v32 = vld [vmem:[#allocation2 + $0x8] sm:$0xf] }
 0x27f   : > { %v713_v36 = vld [vmem:[#allocation2 + $0x8] sm:$0xf] }
 0x280   : > { %v678_v29 = vld.sshfl [vmem:[#allocation1] sm:$0xff pattern:$0x75316420]  ;;  %v679_v30 = vld.sshfl [vmem:[#allocation1 + $0x8] sm:$0xff pattern:$0x75316420] }
 0x281   : > { %692 = vst [vmem:[#allocation1 + $0x1] ss:$2 sm:$0xff] %v2132_v27  ;;  %v737_v40 = vld [vmem:[#allocation2 + $0x8] sm:$0xf] }
 0x282   : > { %684 = vst [vmem:[#allocation3] sm:$0xf] %v678_v29  ;;  %v762_v44 = vld [vmem:[#allocation2 + $0x8] sm:$0xf] }
 0x283   : > { %685 = vst [vmem:[#allocation3 + $0x8] sm:$0xf] %v679_v30  ;;  %v786_v48 = vld [vmem:[#allocation2 + $0x8] sm:$0xf] }
 0x284   : > { %v811_v52 = vld [vmem:[#allocation2 + $0x8] sm:$0xf] }
 0x285   : > { %v680_v31 = vld.sshfl [vmem:[#allocation1 + $0x10] sm:$0xff pattern:$0x75316420] }
 0x286   : > { %694 = vst [vmem:[#allocation1 + $0x11] ss:$2 sm:$0xff] %v688_v32  ;;  %v835_v55 = vld [vmem:[#allocation2 + $0x8] sm:$0xf] }
 0x287   : > { %686 = vst.msk [vmem:[#allocation3 + $0x10] sm:$0xf] %vm334_vm5, %v680_v31  ;;  %v860_v59 = vld [vmem:[#allocation2 + $0x8] sm:$0xf] }
 0x288   : > { %v696_v33 = vld.sshfl [vmem:[#allocation1 + $0x8] sm:$0xff pattern:$0x75316420]  ;;  %v695_v34 = vld.sshfl [vmem:[#allocation1] sm:$0xff pattern:$0x75316420] }
 0x289   : > { %698 = vrot.lane.b32.xlu0 %v695_v34, %s1936_s11  ;;  %716 = vst [vmem:[#allocation1] ss:$2 sm:$0xff] %v2132_v27 }
 0x28d   : > { %v697_v35 = vld.sshfl [vmem:[#allocation1 + $0x10] sm:$0xff pattern:$0x75316420] }
 0x28e   : > { %718 = vst [vmem:[#allocation1 + $0x10] ss:$2 sm:$0xff] %v713_v36 }
 0x290   : > { %v720_v37 = vld.sshfl [vmem:[#allocation1 + $0x8] sm:$0xff pattern:$0x75316420]  ;;  %v719_v38 = vld.sshfl [vmem:[#allocation1] sm:$0xff pattern:$0x75316420] }
 0x291   : > { %724 = vrot.lane.b32.xlu1 %v720_v37, %s1937_s12  ;;  %722 = vrot.lane.b32.xlu0 %v719_v38, %s1937_s12  ;;  %741 = vst [vmem:[#allocation1 + $0x1] ss:$2 sm:$0xff] %v2132_v27 }
 0x295   : > { %v721_v39 = vld.sshfl [vmem:[#allocation1 + $0x10] sm:$0xff pattern:$0x75316420] }
 0x296   : > { %743 = vst [vmem:[#allocation1 + $0x11] ss:$2 sm:$0xff] %v737_v40 }
 0x298   : > { %v745_v41 = vld.sshfl [vmem:[#allocation1 + $0x8] sm:$0xff pattern:$0x75316420]  ;;  %v744_v42 = vld.sshfl [vmem:[#allocation1] sm:$0xff pattern:$0x75316420] }
 0x299   : > { %749 = vrot.lane.b32.xlu0 %v745_v41, %s1938_s13  ;;  %747 = vrot.lane.b32.xlu2 %v744_v42, %s1938_s13  ;;  %765 = vst [vmem:[#allocation1] ss:$2 sm:$0xff] %v2132_v27 }
 0x29d   : > { %v746_v43 = vld.sshfl [vmem:[#allocation1 + $0x10] sm:$0xff pattern:$0x75316420] }
 0x29e   : > { %767 = vst [vmem:[#allocation1 + $0x10] ss:$2 sm:$0xff] %v762_v44 }
 0x2a0   : > { %v769_v45 = vld.sshfl [vmem:[#allocation1 + $0x8] sm:$0xff pattern:$0x75316420]  ;;  %v768_v46 = vld.sshfl [vmem:[#allocation1] sm:$0xff pattern:$0x75316420] }
 0x2a1   : > { %773 = vrot.lane.b32.xlu2 %v769_v45, %s1939_s14  ;;  %771 = vrot.lane.b32.xlu1 %v768_v46, %s1939_s14  ;;  %790 = vst [vmem:[#allocation1 + $0x1] ss:$2 sm:$0xff] %v2132_v27 }
 0x2a5   : > { %v770_v47 = vld.sshfl [vmem:[#allocation1 + $0x10] sm:$0xff pattern:$0x75316420] }
 0x2a6   : > { %792 = vst [vmem:[#allocation1 + $0x11] ss:$2 sm:$0xff] %v786_v48 }
 0x2a8   : > { %v794_v49 = vld.sshfl [vmem:[#allocation1 + $0x8] sm:$0xff pattern:$0x75316420]  ;;  %v793_v50 = vld.sshfl [vmem:[#allocation1] sm:$0xff pattern:$0x75316420] }
 0x2a9   : > { %798 = vrot.lane.b32.xlu1 %v794_v49, %s1940_s18  ;;  %796 = vrot.lane.b32.xlu0 %v793_v50, %s1940_s18  ;;  %814 = vst [vmem:[#allocation1] ss:$2 sm:$0xff] %v2132_v27 }
 0x2ad   : > { %v795_v51 = vld.sshfl [vmem:[#allocation1 + $0x10] sm:$0xff pattern:$0x75316420] }
 0x2ae   : > { %816 = vst [vmem:[#allocation1 + $0x10] ss:$2 sm:$0xff] %v811_v52 }
 0x2b0   : > { %v818_v53 = vld.sshfl [vmem:[#allocation1 + $0x8] sm:$0xff pattern:$0x75316420]  ;;  %v817_v54 = vld.sshfl [vmem:[#allocation1] sm:$0xff pattern:$0x75316420] }
 0x2b1   : > { %822 = vrot.lane.b32.xlu1 %v818_v53, %s1941_s19  ;;  %820 = vrot.lane.b32.xlu0 %v817_v54, %s1941_s19  ;;  %839 = vst [vmem:[#allocation1 + $0x1] ss:$2 sm:$0xff] %v2132_v27 }
 0x2b5   : > { %v819_v56 = vld.sshfl [vmem:[#allocation1 + $0x10] sm:$0xff pattern:$0x75316420] }
 0x2b6   : > { %841 = vst [vmem:[#allocation1 + $0x11] ss:$2 sm:$0xff] %v835_v55 }
 0x2b8   : > { %v843_v57 = vld.sshfl [vmem:[#allocation1 + $0x8] sm:$0xff pattern:$0x75316420]  ;;  %v842_v58 = vld.sshfl [vmem:[#allocation1] sm:$0xff pattern:$0x75316420] }
 0x2b9   : > { %824 = vrot.lane.b32.xlu1 %v819_v56, %s1941_s19  ;;  %847 = vrot.lane.b32.xlu0 %v843_v57, %s1942_s20  ;;  %863 = vst [vmem:[#allocation1] ss:$2 sm:$0xff] %v2132_v27  ;;  %v1836_v56 = vld [vmem:[%s2432_s1 + $0x4] sm:$0xf] }
 0x2ba   : > { %845 = vrot.lane.b32.xlu2 %v842_v58, %s1942_s20 }
 0x2bd   : > { %v844_v60 = vld.sshfl [vmem:[#allocation1 + $0x10] sm:$0xff pattern:$0x75316420] }
 0x2be   : > { %865 = vst [vmem:[#allocation1 + $0x10] ss:$2 sm:$0xff] %v860_v59 }
 0x2c0   : > { %v866_v61 = vld.sshfl [vmem:[#allocation1] sm:$0xff pattern:$0x75316420]  ;;  %v867_v62 = vld.sshfl [vmem:[#allocation1 + $0x8] sm:$0xff pattern:$0x75316420] }
 0x2c1   : > { %800 = vrot.lane.b32.xlu0 %v795_v51, %s1940_s18  ;;  %869 = vrot.lane.b32.xlu1 %v866_v61, %s1943_s21 }
 0x2c2   : > { %849 = vrot.lane.b32.xlu2 %v844_v60, %s1942_s20 }
 0x2c5   : > { %v868_v0 = vld.sshfl [vmem:[#allocation1 + $0x10] sm:$0xff pattern:$0x75316420] }
 0x2c9   : > { %702 = vrot.lane.b32.xlu0 %v697_v35, %s1936_s11  ;;  %700 = vrot.lane.b32.xlu1 %v696_v33, %s1936_s11 }
 0x2ca   : > { %775 = vrot.lane.b32.xlu2 %v770_v47, %s1939_s14 }
 0x2d1   : > { %726 = vrot.lane.b32.xlu1 %v721_v39, %s1937_s12 }
 0x2d2   : > { %871 = vrot.lane.b32.xlu2 %v867_v62, %s1943_s21 }
 0x2d9   : > { %904 = vperm.xlu1 %1909, %v1837_v63  }
 0x2da   : > { %873 = vrot.lane.b32.xlu2 %v868_v0, %s1943_s21 }
 0x2e2   : > { %751 = vrot.lane.b32.xlu2 %v746_v43, %s1938_s13 }
 0x2f3   : > { %v748_v2 = vpop.permute.xlu2 %747 }
 0x2fb   : > { %v699_v1 = vpop.permute.xlu0 %698  ;;  %v774_v8 = vpop.permute.xlu2 %773 }
 0x303   : > { %v2171_v3 = vpop.permute.xlu1 %724  ;;  %v723_v4 = vpop.permute.xlu0 %722 }
 0x304   : > { %v728_v5 = vsel %vm379_vm9, %v723_v4, %v2171_v3 }
 0x305   : > { %733 = vst [vmem:[#allocation3 + $0x18] sm:$0xf] %v728_v5 }
 0x30b   : > { %v750_v7 = vpop.permute.xlu0 %749 }
 0x30c   : > { %v753_v9 = vsel %vm405_vm8, %v748_v2, %v750_v7 }
 0x30d   : > { %758 = vst [vmem:[#allocation3 + $0x18] sm:$0xf0] %v753_v9 }
 0x313   : > { %v772_v10 = vpop.permute.xlu1 %771 }
 0x314   : > { %v777_v11 = vsel %vm430_vm10, %v772_v10, %v774_v8  ;;  %v846_v13 = vpop.permute.xlu2 %845  ;;  %v888_v54 = vld [vmem:[#allocation3 + $0x18] sm:$0xff] }
 0x315   : > { %782 = vst [vmem:[#allocation3 + $0x30] sm:$0xf] %v777_v11 }
 0x31b   : > { %v799_v14 = vpop.permute.xlu1 %798  ;;  %v797_v15 = vpop.permute.xlu0 %796 }
 0x31c   : > { %v802_v17 = vsel %vm456_vm11, %v797_v15, %v799_v14  ;;  %v850_v18 = vpop.permute.xlu2 %849 }
 0x31d   : > { %807 = vst [vmem:[#allocation3 + $0x30] sm:$0xf0] %v802_v17 }
 0x31e   : > { %858 = vst.msk [vmem:[#allocation3 + $0x58] sm:$0xf0] %vm361_vm6, %v850_v18 }
 0x323   : > { %v823_v19 = vpop.permute.xlu1 %822  ;;  %v821_v20 = vpop.permute.xlu0 %820 }
 0x324   : > { %v826_v21 = vsel %vm481_vm12, %v821_v20, %v823_v19  ;;  %v776_v23 = vpop.permute.xlu2 %775  ;;  %v891_v51 = vld [vmem:[#allocation3 + $0x30] sm:$0xff] }
 0x325   : > { %831 = vst [vmem:[#allocation3 + $0x48] sm:$0xf] %v826_v21  ;;  %v778_v24 = vsel %vm430_vm10, %v774_v8, %v776_v23 }
 0x326   : > { %783 = vst [vmem:[#allocation3 + $0x38] sm:$0xf] %v778_v24 }
 0x327   : > { %784 = vst.msk [vmem:[#allocation3 + $0x40] sm:$0xf] %vm334_vm5, %v776_v23 }
 0x32b   : > { %v825_v25 = vpop.permute.xlu1 %824  ;;  %v848_v26 = vpop.permute.xlu0 %847 }
 0x32c   : > { %v827_v27 = vsel %vm481_vm12, %v823_v19, %v825_v25  ;;  %833 = vst.msk [vmem:[#allocation3 + $0x58] sm:$0xf] %vm334_vm5, %v825_v25  ;;  %v851_v28 = vsel %vm507_vm15, %v846_v13, %v848_v26  ;;  %v852_v29 = vsel %vm507_vm15, %v848_v26, %v850_v18  ;;  %v872_v30 = vpop.permute.xlu2 %871 }
 0x32d   : > { %832 = vst [vmem:[#allocation3 + $0x50] sm:$0xf] %v827_v27 }
 0x32e   : > { %856 = vst [vmem:[#allocation3 + $0x48] sm:$0xf0] %v851_v28 }
 0x32f   : > { %857 = vst [vmem:[#allocation3 + $0x50] sm:$0xf0] %v852_v29 }
 0x333   : > { %v801_v31 = vpop.permute.xlu0 %800  ;;  %v870_v32 = vpop.permute.xlu1 %869  ;;  %v896_v47 = vld [vmem:[#allocation3 + $0x58] sm:$0xff] }
 0x334   : > { %v803_v33 = vsel %vm456_vm11, %v799_v14, %v801_v31  ;;  %809 = vst.msk [vmem:[#allocation3 + $0x40] sm:$0xf0] %vm361_vm6, %v801_v31  ;;  %v874_v34 = vpop.permute.xlu2 %873  ;;  %v875_v36 = vsel %vm2439_vm0, %v870_v32, %v872_v30 }
 0x335   : > { %808 = vst [vmem:[#allocation3 + $0x38] sm:$0xf0] %v803_v33  ;;  %v876_v35 = vsel %vm2439_vm0, %v872_v30, %v874_v34  ;;  %v894_v48 = vld [vmem:[#allocation3 + $0x48] sm:$0xff]  ;;  %vm2444_vm0 = vmmov %vm2442_vm3 }
 0x336   : > { %881 = vst [vmem:[#allocation3 + $0x68] sm:$0xf] %v876_v35  ;;  %v895_v46 = vld [vmem:[#allocation3 + $0x50] sm:$0xff] }
 0x337   : > { %882 = vst.msk [vmem:[#allocation3 + $0x70] sm:$0xf] %vm334_vm5, %v874_v34 }
 0x338   : > { %880 = vst [vmem:[#allocation3 + $0x60] sm:$0xf] %v875_v36 }
 0x33b   : > { %v703_v37 = vpop.permute.xlu0 %702  ;;  %v701_v38 = vpop.permute.xlu1 %700  ;;  %v893_v50 = vld [vmem:[#allocation3 + $0x40] sm:$0xff] }
 0x33c   : > { %711 = vst.msk [vmem:[#allocation3 + $0x10] sm:$0xf0] %vm361_vm6, %v703_v37  ;;  %v752_v39 = vpop.permute.xlu2 %751  ;;  %v704_v40 = vsel %vm353_vm7, %v699_v1, %v701_v38  ;;  %v705_v42 = vsel %vm353_vm7, %v701_v38, %v703_v37  ;;  %v892_v49 = vld [vmem:[#allocation3 + $0x38] sm:$0xff] }
 0x33d   : > { %v754_v41 = vsel %vm405_vm8, %v750_v7, %v752_v39  ;;  %760 = vst.msk [vmem:[#allocation3 + $0x28] sm:$0xf0] %vm361_vm6, %v752_v39  ;;  %v898_v43 = vld [vmem:[#allocation3 + $0x68] sm:$0xf] }
 0x33e   : > { %759 = vst [vmem:[#allocation3 + $0x20] sm:$0xf0] %v754_v41  ;;  %v899_v44 = vld [vmem:[#allocation3 + $0x70] sm:$0xf]  ;;  %1840 = vmatpush.msk.msrb.mxu0 %vm567_vm14, %v898_v43 }
 0x33f   : > { %709 = vst [vmem:[#allocation3] sm:$0xf0] %v704_v40  ;;  %1842 = vmatpush.msk.msrb.mxu1 %vm567_vm14, %v899_v44  ;;  %v897_v45 = vld [vmem:[#allocation3 + $0x60] sm:$0xf] }
 0x340   : > { %710 = vst [vmem:[#allocation3 + $0x8] sm:$0xf0] %v705_v42  ;;  %1838 = vmatpush.msk.msra.mxu3 %vm567_vm14, %v897_v45  ;;  %951 = vmatpush.msrb.mxu0 %v895_v46 }
 0x341   : > { %971 = vmatpush.msrb.mxu1 %v896_v47 }
 0x342   : > { %931 = vmatpush.msra.mxu3 %v894_v48  ;;  %952 = vmatpush.msrb.mxu0 %v892_v49 }
 0x343   : > { %972 = vmatpush.msrb.mxu1 %v893_v50  ;;  %v727_v52 = vpop.permute.xlu1 %726  ;;  %v887_v59 = vld [vmem:[#allocation3 + $0x10] sm:$0xff] }
 0x344   : > { %932 = vmatpush.msra.mxu3 %v891_v51  ;;  %v729_v53 = vsel %vm379_vm9, %v2171_v3, %v727_v52  ;;  %735 = vst.msk [vmem:[#allocation3 + $0x28] sm:$0xf] %vm334_vm5, %v727_v52 }
 0x345   : > { %734 = vst [vmem:[#allocation3 + $0x20] sm:$0xf] %v729_v53 }
 0x346   : > { %933 = vmatpush.msra.mxu3 %v888_v54  ;;  %v885_v55 = vld [vmem:[#allocation3] sm:$0xff] }
 0x347   : > { %v886_v60 = vld [vmem:[#allocation3 + $0x8] sm:$0xff] }
 0x348   : > { %934 = vmatpush.msra.mxu3 %v885_v55 }
 0x349   : > { %1839 = vmatmul.msk.f32.vlgmr.msra.gmra.mxu3 %vm2442_vm3, %v1836_v56 }
 0x34b   : > { %v890_v57 = vld [vmem:[#allocation3 + $0x28] sm:$0xff]  ;;  %v905_v61 = vpop.permute.xlu1 %904 }
 0x34c   : > { %973 = vmatpush.msrb.mxu1 %v890_v57  ;;  %v889_v58 = vld [vmem:[#allocation3 + $0x20] sm:$0xff] }
 0x34d   : > { %953 = vmatpush.msrb.mxu0 %v889_v58  ;;  %v1845_v58 = vld [vmem:[%s2433_s2 + $0x8] sm:$0xf] }
 0x34e   : > { %974 = vmatpush.msrb.mxu1 %v887_v59 }
 0x34f   : > { %954 = vmatpush.msrb.mxu0 %v886_v60  ;;  %1843 = vmatmul.msk.f32.vlgmr.msrb.gmra.mxu1 %vm2443_vm4, %v1836_v56 }
 0x350   : > { %1841 = vmatmul.msk.f32.vlgmr.msrb.gmra.mxu0 %vm2444_vm0, %v1836_v56  ;;  %vm2445_vm0 = vcmask 736256  }
 0x351   : > { %vm2446_vm3 = vmmov %vm2445_vm0 }
 0x3cc   : > { %v936_v62 = vpop.f32.mrf.mxu3  ;;  %v976_v63 = vpop.f32.mrf.mxu1 }
 0x3cd   : > { %v937_v0 = vadd.f32 %v936_v62, %v905_v61  ;;  %v977_v1 = vadd.f32 %v976_v63, %v905_v61  ;;  %v956_v2 = vpop.f32.mrf.mxu0 }
 0x3ce   : > { %v957_v3 = vadd.f32 %v956_v2, %v905_v61 }
 0x3cf   : > { %v981_v4 = vmax.f32 %v977_v1, 0.0  ;;  %v979_v5 = vmax.f32 %v937_v0, 0.0 }
 0x3d0   : > { %v980_v7 = vmax.f32 %v957_v3, 0.0 }
 0x3d1   : > { %v984_v8 = vmul.f32 %v981_v4, %v2111_v6  ;;  %v982_v10 = vmul.f32 %v979_v5, %v2118_v16 }
 0x3d2   : > { %v983_v9 = vmul.f32 %v980_v7, %v2115_v12 }
 0x3d3   : > { %992 = vrot.lane.b32.xlu0 %v984_v8, %s1945_s30 }
 0x3d4   : > { %v988_v11 = vrot.slane %v983_v9, 4 }
 0x3d6   : > { %v989_v13 = vsel %vm567_vm14, %v982_v10, %v988_v11 }
 0x3d7   : > { %990 = vrot.lane.b32.xlu2 %v989_v13, %s1945_s30 }
 0x431   : > { %v991_v14 = vpop.permute.xlu2 %990 }
 0x432   : > { %v994_v15 = vrot.slane %v991_v14, 4 }
 0x434   : > { %v995_v17 = vsel %vm660_vm13, %v994_v15, %v991_v14 }
 0x435   : > { %999 = vst.msk [vmem:[#allocation2] sm:$0xff] %vm2123_vm1, %v995_v17 }
 0x43c   : > { %v1001_v18 = vld [vmem:[#allocation2] sm:$0xff] }
 0x43d   : > { %1005 = vst [vmem:[#allocation1] ss:$2 sm:$0xff] %v1001_v18 }
 0x444   : > { %v1008_v19 = vld.sshfl [vmem:[#allocation1] sm:$0xff pattern:$0x75316420]  ;;  %v1009_v20 = vld.sshfl [vmem:[#allocation1 + $0x8] sm:$0xff pattern:$0x75316420] }
 0x445   : > { %1022 = vst [vmem:[#allocation1 + $0x1] ss:$2 sm:$0xff] %v1001_v18  ;;  %v993_v21 = vpop.permute.xlu0 %992 }
 0x446   : > { %1014 = vst [vmem:[#allocation3] sm:$0xf] %v1008_v19  ;;  %v996_v23 = vsel %vm660_vm13, %v994_v15, %v993_v21 }
 0x447   : > { %1015 = vst [vmem:[#allocation3 + $0x8] sm:$0xf] %v1009_v20 }
 0x448   : > { %1000 = vst.msk [vmem:[#allocation2 + $0x8] sm:$0xf] %vm669_vm2, %v996_v23 }
 0x44c   : > { %v2219_v24 = vld.sshfl [vmem:[#allocation1] sm:$0xff pattern:$0x75316420]  ;;  %v1026_v25 = vld.sshfl [vmem:[#allocation1 + $0x8] sm:$0xff pattern:$0x75316420] }
 0x44d   : > { %1046 = vst [vmem:[#allocation1] ss:$2 sm:$0xff] %v1001_v18  ;;  %1030 = vrot.lane.b32.xlu2 %v1026_v25, %s1936_s11 }
 0x44f   : > { %v1002_v26 = vld [vmem:[#allocation2 + $0x8] sm:$0xf] }
 0x450   : > { %1007 = vst [vmem:[#allocation1 + $0x10] ss:$2 sm:$0xff] %v1002_v26  ;;  %v1018_v29 = vld [vmem:[#allocation2 + $0x8] sm:$0xf] }
 0x451   : > { %v1043_v33 = vld [vmem:[#allocation2 + $0x8] sm:$0xf] }
 0x452   : > { %v1067_v37 = vld [vmem:[#allocation2 + $0x8] sm:$0xf] }
 0x453   : > { %v1092_v41 = vld [vmem:[#allocation2 + $0x8] sm:$0xf] }
 0x454   : > { %v2222_v27 = vld.sshfl [vmem:[#allocation1] sm:$0xff pattern:$0x75316420]  ;;  %v1050_v28 = vld.sshfl [vmem:[#allocation1 + $0x8] sm:$0xff pattern:$0x75316420] }
 0x455   : > { %1071 = vst [vmem:[#allocation1 + $0x1] ss:$2 sm:$0xff] %v1001_v18  ;;  %1054 = vrot.lane.b32.xlu2 %v1050_v28, %s1937_s12  ;;  %v1116_v45 = vld [vmem:[#allocation2 + $0x8] sm:$0xf] }
 0x456   : > { %v1141_v49 = vld [vmem:[#allocation2 + $0x8] sm:$0xf] }
 0x457   : > { %v1010_v30 = vld.sshfl [vmem:[#allocation1 + $0x10] sm:$0xff pattern:$0x75316420] }
 0x458   : > { %1024 = vst [vmem:[#allocation1 + $0x11] ss:$2 sm:$0xff] %v1018_v29  ;;  %v1165_v51 = vld [vmem:[#allocation2 + $0x8] sm:$0xf] }
 0x459   : > { %1016 = vst.msk [vmem:[#allocation3 + $0x10] sm:$0xf] %vm334_vm5, %v1010_v30  ;;  %v1190_v53 = vld [vmem:[#allocation2 + $0x8] sm:$0xf] }
 0x45c   : > { %v1074_v31 = vld.sshfl [vmem:[#allocation1] sm:$0xff pattern:$0x75316420]  ;;  %v1075_v32 = vld.sshfl [vmem:[#allocation1 + $0x8] sm:$0xff pattern:$0x75316420] }
 0x45d   : > { %1095 = vst [vmem:[#allocation1] ss:$2 sm:$0xff] %v1001_v18  ;;  %1079 = vrot.lane.b32.xlu1 %v1075_v32, %s1938_s13 }
 0x45f   : > { %v1027_v34 = vld.sshfl [vmem:[#allocation1 + $0x10] sm:$0xff pattern:$0x75316420] }
 0x460   : > { %1032 = vrot.lane.b32.xlu0 %v1027_v34, %s1936_s11  ;;  %1048 = vst [vmem:[#allocation1 + $0x10] ss:$2 sm:$0xff] %v1043_v33 }
 0x464   : > { %v1098_v35 = vld.sshfl [vmem:[#allocation1] sm:$0xff pattern:$0x75316420]  ;;  %v1099_v36 = vld.sshfl [vmem:[#allocation1 + $0x8] sm:$0xff pattern:$0x75316420] }
 0x465   : > { %1120 = vst [vmem:[#allocation1 + $0x1] ss:$2 sm:$0xff] %v1001_v18 }
 0x467   : > { %v1051_v38 = vld.sshfl [vmem:[#allocation1 + $0x10] sm:$0xff pattern:$0x75316420] }
 0x468   : > { %1056 = vrot.lane.b32.xlu0 %v1051_v38, %s1937_s12  ;;  %1073 = vst [vmem:[#allocation1 + $0x11] ss:$2 sm:$0xff] %v1067_v37 }
 0x46c   : > { %v1123_v39 = vld.sshfl [vmem:[#allocation1] sm:$0xff pattern:$0x75316420]  ;;  %v1124_v40 = vld.sshfl [vmem:[#allocation1 + $0x8] sm:$0xff pattern:$0x75316420] }
 0x46d   : > { %1144 = vst [vmem:[#allocation1] ss:$2 sm:$0xff] %v1001_v18  ;;  %1128 = vrot.lane.b32.xlu1 %v1124_v40, %s1940_s18 }
 0x46f   : > { %v1076_v42 = vld.sshfl [vmem:[#allocation1 + $0x10] sm:$0xff pattern:$0x75316420] }
 0x470   : > { %1081 = vrot.lane.b32.xlu2 %v1076_v42, %s1938_s13  ;;  %1097 = vst [vmem:[#allocation1 + $0x10] ss:$2 sm:$0xff] %v1092_v41 }
 0x474   : > { %v1147_v43 = vld.sshfl [vmem:[#allocation1] sm:$0xff pattern:$0x75316420]  ;;  %v1148_v44 = vld.sshfl [vmem:[#allocation1 + $0x8] sm:$0xff pattern:$0x75316420] }
 0x475   : > { %1126 = vrot.lane.b32.xlu1 %v1123_v39, %s1940_s18  ;;  %1169 = vst [vmem:[#allocation1 + $0x1] ss:$2 sm:$0xff] %v1001_v18 }
 0x477   : > { %v1100_v46 = vld.sshfl [vmem:[#allocation1 + $0x10] sm:$0xff pattern:$0x75316420] }
 0x478   : > { %1105 = vrot.lane.b32.xlu0 %v1100_v46, %s1939_s14  ;;  %1122 = vst [vmem:[#allocation1 + $0x11] ss:$2 sm:$0xff] %v1116_v45  ;;  %1103 = vrot.lane.b32.xlu2 %v1099_v36, %s1939_s14 }
 0x47c   : > { %v1173_v47 = vld.sshfl [vmem:[#allocation1 + $0x8] sm:$0xff pattern:$0x75316420]  ;;  %v1172_v48 = vld.sshfl [vmem:[#allocation1] sm:$0xff pattern:$0x75316420] }
 0x47d   : > { %1193 = vst [vmem:[#allocation1] ss:$2 sm:$0xff] %v1001_v18 }
 0x47f   : > { %v1125_v50 = vld.sshfl [vmem:[#allocation1 + $0x10] sm:$0xff pattern:$0x75316420] }
 0x480   : > { %1130 = vrot.lane.b32.xlu2 %v1125_v50, %s1940_s18  ;;  %1146 = vst [vmem:[#allocation1 + $0x10] ss:$2 sm:$0xff] %v1141_v49  ;;  %1101 = vrot.lane.b32.xlu0 %v1098_v35, %s1939_s14 }
 0x484   : > { %v1197_v56 = vld.sshfl [vmem:[#allocation1 + $0x8] sm:$0xff pattern:$0x75316420]  ;;  %v1196_v57 = vld.sshfl [vmem:[#allocation1] sm:$0xff pattern:$0x75316420] }
 0x487   : > { %v1149_v52 = vld.sshfl [vmem:[#allocation1 + $0x10] sm:$0xff pattern:$0x75316420] }
 0x488   : > { %1154 = vrot.lane.b32.xlu1 %v1149_v52, %s1941_s19  ;;  %1171 = vst [vmem:[#allocation1 + $0x11] ss:$2 sm:$0xff] %v1165_v51  ;;  %1152 = vrot.lane.b32.xlu0 %v1148_v44, %s1941_s19 }
 0x489   : > { %1177 = vrot.lane.b32.xlu2 %v1173_v47, %s1942_s20 }
 0x48f   : > { %v1174_v54 = vld.sshfl [vmem:[#allocation1 + $0x10] sm:$0xff pattern:$0x75316420] }
 0x490   : > { %1150 = vrot.lane.b32.xlu0 %v1147_v43, %s1941_s19  ;;  %1175 = vrot.lane.b32.xlu1 %v1172_v48, %s1942_s20  ;;  %1195 = vst [vmem:[#allocation1 + $0x10] ss:$2 sm:$0xff] %v1190_v53  ;;  %v1844_v43 = vld [vmem:[%s2432_s1 + $0x8] sm:$0xf] }
 0x497   : > { %v1198_v55 = vld.sshfl [vmem:[#allocation1 + $0x10] sm:$0xff pattern:$0x75316420] }
 0x498   : > { %1179 = vrot.lane.b32.xlu0 %v1174_v54, %s1942_s20  ;;  %1203 = vrot.lane.b32.xlu2 %v1198_v55, %s1943_s21 }
 0x499   : > { %1201 = vrot.lane.b32.xlu1 %v1197_v56, %s1943_s21 }
 0x4a0   : > { %1028 = vrot.lane.b32.xlu0 %v2219_v24, %s1936_s11  ;;  %1077 = vrot.lane.b32.xlu2 %v1074_v31, %s1938_s13 }
 0x4a1   : > { %1199 = vrot.lane.b32.xlu1 %v1196_v57, %s1943_s21 }
 0x4a7   : > { %v1031_v59 = vpop.permute.xlu2 %1030 }
 0x4a9   : > { %1052 = vrot.lane.b32.xlu1 %v2222_v27, %s1937_s12 }
 0x4af   : > { %v2253_v60 = vpop.permute.xlu2 %1054 }
 0x4b1   : > { %1234 = vperm.xlu1 %1909, %v1845_v58  }
 0x4ca   : > { %v1082_v61 = vpop.permute.xlu2 %1081 }
 0x4cb   : > { %1090 = vst.msk [vmem:[#allocation3 + $0x28] sm:$0xf0] %vm361_vm6, %v1082_v61 }
 0x4cf   : > { %v1080_v62 = vpop.permute.xlu1 %1079 }
 0x4d0   : > { %v1084_v63 = vsel %vm405_vm8, %v1080_v62, %v1082_v61 }
 0x4d1   : > { %1089 = vst [vmem:[#allocation3 + $0x20] sm:$0xf0] %v1084_v63 }
 0x4d2   : > { %v1033_v0 = vpop.permute.xlu0 %1032  ;;  %v1104_v1 = vpop.permute.xlu2 %1103 }
 0x4d3   : > { %v1035_v2 = vsel %vm353_vm7, %v1031_v59, %v1033_v0  ;;  %1041 = vst.msk [vmem:[#allocation3 + $0x10] sm:$0xf0] %vm361_vm6, %v1033_v0 }
 0x4d4   : > { %1040 = vst [vmem:[#allocation3 + $0x8] sm:$0xf0] %v1035_v2 }
 0x4da   : > { %v1057_v3 = vpop.permute.xlu0 %1056  ;;  %v1131_v4 = vpop.permute.xlu2 %1130  ;;  %v1217_v45 = vld [vmem:[#allocation3 + $0x10] sm:$0xff] }
 0x4db   : > { %v1059_v5 = vsel %vm379_vm9, %v2253_v60, %v1057_v3  ;;  %1065 = vst.msk [vmem:[#allocation3 + $0x28] sm:$0xf] %vm334_vm5, %v1057_v3  ;;  %v1216_v50 = vld [vmem:[#allocation3 + $0x8] sm:$0xff] }
 0x4dc   : > { %1064 = vst [vmem:[#allocation3 + $0x20] sm:$0xf] %v1059_v5 }
 0x4dd   : > { %1139 = vst.msk [vmem:[#allocation3 + $0x40] sm:$0xf0] %vm361_vm6, %v1131_v4 }
 0x4df   : > { %v1129_v7 = vpop.permute.xlu1 %1128 }
 0x4e0   : > { %v1133_v8 = vsel %vm456_vm11, %v1129_v7, %v1131_v4 }
 0x4e1   : > { %1138 = vst [vmem:[#allocation3 + $0x38] sm:$0xf0] %v1133_v8 }
 0x4e2   : > { %v1220_v42 = vld [vmem:[#allocation3 + $0x28] sm:$0xff] }
 0x4e3   : > { %v1178_v11 = vpop.permute.xlu2 %1177  ;;  %v1219_v46 = vld [vmem:[#allocation3 + $0x20] sm:$0xff] }
 0x4e7   : > { %v1127_v9 = vpop.permute.xlu1 %1126 }
 0x4e8   : > { %v1132_v10 = vsel %vm456_vm11, %v1127_v9, %v1129_v7 }
 0x4e9   : > { %1137 = vst [vmem:[#allocation3 + $0x30] sm:$0xf0] %v1132_v10 }
 0x4ea   : > { %v1106_v13 = vpop.permute.xlu0 %1105 }
 0x4eb   : > { %v1108_v14 = vsel %vm430_vm10, %v1104_v1, %v1106_v13  ;;  %1114 = vst.msk [vmem:[#allocation3 + $0x40] sm:$0xf] %vm334_vm5, %v1106_v13 }
 0x4ec   : > { %1113 = vst [vmem:[#allocation3 + $0x38] sm:$0xf] %v1108_v14 }
 0x4f2   : > { %v1102_v15 = vpop.permute.xlu0 %1101  ;;  %v1204_v17 = vpop.permute.xlu2 %1203  ;;  %v1223_v40 = vld [vmem:[#allocation3 + $0x40] sm:$0xff] }
 0x4f3   : > { %v1107_v18 = vsel %vm430_vm10, %v1102_v15, %v1104_v1  ;;  %1212 = vst.msk [vmem:[#allocation3 + $0x70] sm:$0xf] %vm334_vm5, %v1204_v17  ;;  %v1222_v44 = vld [vmem:[#allocation3 + $0x38] sm:$0xff] }
 0x4f4   : > { %1112 = vst [vmem:[#allocation3 + $0x30] sm:$0xf] %v1107_v18 }
 0x4fa   : > { %v1155_v19 = vpop.permute.xlu1 %1154  ;;  %v1153_v20 = vpop.permute.xlu0 %1152  ;;  %v1229_v21 = vld [vmem:[#allocation3 + $0x70] sm:$0xf] }
 0x4fb   : > { %1163 = vst.msk [vmem:[#allocation3 + $0x58] sm:$0xf] %vm334_vm5, %v1155_v19  ;;  %v1157_v23 = vsel %vm481_vm12, %v1153_v20, %v1155_v19  ;;  %v1078_v24 = vpop.permute.xlu2 %1077  ;;  %1850 = vmatpush.msk.msra.mxu0 %vm567_vm14, %v1229_v21  ;;  %v1221_v52 = vld [vmem:[#allocation3 + $0x30] sm:$0xff] }
 0x4fc   : > { %1162 = vst [vmem:[#allocation3 + $0x50] sm:$0xf] %v1157_v23  ;;  %v1083_v25 = vsel %vm405_vm8, %v1078_v24, %v1080_v62 }
 0x4fd   : > { %1088 = vst [vmem:[#allocation3 + $0x18] sm:$0xf0] %v1083_v25 }
 0x502   : > { %v1151_v26 = vpop.permute.xlu0 %1150  ;;  %v1176_v27 = vpop.permute.xlu1 %1175 }
 0x503   : > { %v1156_v28 = vsel %vm481_vm12, %v1151_v26, %v1153_v20  ;;  %v1181_v29 = vsel %vm507_vm15, %v1176_v27, %v1178_v11 }
 0x504   : > { %1161 = vst [vmem:[#allocation3 + $0x48] sm:$0xf] %v1156_v28 }
 0x505   : > { %1186 = vst [vmem:[#allocation3 + $0x48] sm:$0xf0] %v1181_v29 }
 0x50a   : > { %v1180_v30 = vpop.permute.xlu0 %1179 }
 0x50b   : > { %v1182_v31 = vsel %vm507_vm15, %v1178_v11, %v1180_v30  ;;  %1188 = vst.msk [vmem:[#allocation3 + $0x58] sm:$0xf0] %vm361_vm6, %v1180_v30  ;;  %v1202_v32 = vpop.permute.xlu1 %1201 }
 0x50c   : > { %1187 = vst [vmem:[#allocation3 + $0x50] sm:$0xf0] %v1182_v31  ;;  %v1206_v33 = vsel %vm2445_vm0, %v1202_v32, %v1204_v17  ;;  %vm2447_vm0 = vmmov %vm2443_vm4  ;;  %v1224_v51 = vld [vmem:[#allocation3 + $0x48] sm:$0xff] }
 0x50d   : > { %1211 = vst [vmem:[#allocation3 + $0x68] sm:$0xf] %v1206_v33 }
 0x512   : > { %v1029_v34 = vpop.permute.xlu0 %1028  ;;  %v1226_v35 = vld [vmem:[#allocation3 + $0x58] sm:$0xff] }
 0x513   : > { %v1034_v36 = vsel %vm353_vm7, %v1029_v34, %v1031_v59  ;;  %v1200_v37 = vpop.permute.xlu1 %1199  ;;  %1301 = vmatpush.msra.mxu0 %v1226_v35  ;;  %v1225_v41 = vld [vmem:[#allocation3 + $0x50] sm:$0xff] }
 0x514   : > { %1039 = vst [vmem:[#allocation3] sm:$0xf0] %v1034_v36  ;;  %v1205_v38 = vsel %vm2446_vm3, %v1200_v37, %v1202_v32  ;;  %v1228_v39 = vld [vmem:[#allocation3 + $0x68] sm:$0xf]  ;;  %vm2448_vm3 = vmmov %vm2447_vm0 }
 0x515   : > { %1210 = vst [vmem:[#allocation3 + $0x60] sm:$0xf] %v1205_v38  ;;  %1848 = vmatpush.msk.msrb.mxu3 %vm567_vm14, %v1228_v39  ;;  %1302 = vmatpush.msra.mxu0 %v1223_v40 }
 0x517   : > { %1281 = vmatpush.msrb.mxu3 %v1225_v41  ;;  %1303 = vmatpush.msra.mxu0 %v1220_v42 }
 0x519   : > { %1282 = vmatpush.msrb.mxu3 %v1222_v44  ;;  %1304 = vmatpush.msra.mxu0 %v1217_v45 }
 0x51a   : > { %1851 = vmatmul.msk.f32.vlgmr.msra.gmra.mxu0 %vm2443_vm4, %v1844_v43  ;;  %vm1699_vm4 = vcmask 781952  }
 0x51b   : > { %1283 = vmatpush.msrb.mxu3 %v1219_v46  ;;  %v1053_v47 = vpop.permute.xlu1 %1052  ;;  %v1215_v54 = vld [vmem:[#allocation3] sm:$0xff] }
 0x51c   : > { %v1058_v48 = vsel %vm379_vm9, %v1053_v47, %v2253_v60  ;;  %v1227_v49 = vld [vmem:[#allocation3 + $0x60] sm:$0xf] }
 0x51d   : > { %1063 = vst [vmem:[#allocation3 + $0x18] sm:$0xf] %v1058_v48  ;;  %1846 = vmatpush.msk.msrb.mxu2 %vm567_vm14, %v1227_v49  ;;  %1284 = vmatpush.msrb.mxu3 %v1216_v50 }
 0x51e   : > { %1849 = vmatmul.msk.f32.vlgmr.msrb.gmra.mxu3 %vm2447_vm0, %v1844_v43 }
 0x51f   : > { %1261 = vmatpush.msrb.mxu2 %v1224_v51 }
 0x521   : > { %1262 = vmatpush.msrb.mxu2 %v1221_v52  ;;  %v1853_v52 = vld [vmem:[%s2433_s2 + $0xc] sm:$0xf] }
 0x523   : > { %v1235_v55 = vpop.permute.xlu1 %1234 }
 0x524   : > { %v1218_v53 = vld [vmem:[#allocation3 + $0x18] sm:$0xff] }
 0x525   : > { %1263 = vmatpush.msrb.mxu2 %v1218_v53 }
 0x527   : > { %1264 = vmatpush.msrb.mxu2 %v1215_v54 }
 0x528   : > { %1847 = vmatmul.msk.f32.vlgmr.msrb.gmra.mxu2 %vm2448_vm3, %v1844_v43  ;;  %vm1713_vm3 = vcmask 1044352  }
 0x597   : > { %v1306_v56 = vpop.f32.mrf.mxu0 }
 0x598   : > { %v1307_v57 = vadd.f32 %v1306_v56, %v1235_v55 }
 0x59a   : > { %v1311_v58 = vmax.f32 %v1307_v57, 0.0 }
 0x59c   : > { %v1314_v59 = vmul.f32 %v1311_v58, %v2111_v6 }
 0x59e   : > { %1322 = vrot.lane.b32.xlu0 %v1314_v59, %s1945_s30 }
 0x5a1   : > { %v1286_v60 = vpop.f32.mrf.mxu3 }
 0x5a2   : > { %v1287_v61 = vadd.f32 %v1286_v60, %v1235_v55 }
 0x5a4   : > { %v1310_v62 = vmax.f32 %v1287_v61, 0.0 }
 0x5a6   : > { %v1313_v0 = vmul.f32 %v1310_v62, %v2115_v12 }
 0x5a8   : > { %v1318_v3 = vrot.slane %v1313_v0, 4 }
 0x5ab   : > { %v1266_v63 = vpop.f32.mrf.mxu2 }
 0x5ac   : > { %v1267_v1 = vadd.f32 %v1266_v63, %v1235_v55 }
 0x5ae   : > { %v1309_v2 = vmax.f32 %v1267_v1, 0.0 }
 0x5b0   : > { %v1312_v4 = vmul.f32 %v1309_v2, %v2118_v16 }
 0x5b2   : > { %v1319_v5 = vsel %vm567_vm14, %v1312_v4, %v1318_v3 }
 0x5b3   : > { %1320 = vrot.lane.b32.xlu2 %v1319_v5, %s1945_s30 }
 0x60d   : > { %v1321_v7 = vpop.permute.xlu2 %1320 }
 0x60e   : > { %v1324_v8 = vrot.slane %v1321_v7, 4 }
 0x610   : > { %v1325_v9 = vsel %vm660_vm13, %v1324_v8, %v1321_v7  ;;  %v1323_v10 = vpop.permute.xlu0 %1322 }
 0x611   : > { %1329 = vst.msk [vmem:[#allocation2] sm:$0xff] %vm2123_vm1, %v1325_v9  ;;  %v1326_v11 = vsel %vm660_vm13, %v1324_v8, %v1323_v10 }
 0x612   : > { %1330 = vst.msk [vmem:[#allocation2 + $0x8] sm:$0xf] %vm669_vm2, %v1326_v11 }
 0x618   : > { %v2301_v13 = vld [vmem:[#allocation2] sm:$0xff] }
 0x619   : > { %1335 = vst [vmem:[#allocation1] ss:$2 sm:$0xff] %v2301_v13  ;;  %v1332_v14 = vld [vmem:[#allocation2 + $0x8] sm:$0xf] }
 0x61a   : > { %1337 = vst [vmem:[#allocation1 + $0x10] ss:$2 sm:$0xff] %v1332_v14  ;;  %v1348_v18 = vld [vmem:[#allocation2 + $0x8] sm:$0xf] }
 0x61b   : > { %v1373_v23 = vld [vmem:[#allocation2 + $0x8] sm:$0xf] }
 0x61c   : > { %v1397_v27 = vld [vmem:[#allocation2 + $0x8] sm:$0xf] }
 0x61d   : > { %v1422_v31 = vld [vmem:[#allocation2 + $0x8] sm:$0xf] }
 0x61e   : > { %v1446_v35 = vld [vmem:[#allocation2 + $0x8] sm:$0xf] }
 0x61f   : > { %v1471_v39 = vld [vmem:[#allocation2 + $0x8] sm:$0xf] }
 0x620   : > { %v1338_v15 = vld.sshfl [vmem:[#allocation1] sm:$0xff pattern:$0x75316420]  ;;  %v1339_v17 = vld.sshfl [vmem:[#allocation1 + $0x8] sm:$0xff pattern:$0x75316420] }
 0x621   : > { %1352 = vst [vmem:[#allocation1 + $0x1] ss:$2 sm:$0xff] %v2301_v13  ;;  %v1340_v19 = vld.sshfl [vmem:[#allocation1 + $0x10] sm:$0xff pattern:$0x75316420] }
 0x622   : > { %1344 = vst [vmem:[#allocation3] sm:$0xf] %v1338_v15  ;;  %v1495_v43 = vld [vmem:[#allocation2 + $0x8] sm:$0xf] }
 0x623   : > { %1345 = vst [vmem:[#allocation3 + $0x8] sm:$0xf] %v1339_v17  ;;  %v1520_v47 = vld [vmem:[#allocation2 + $0x8] sm:$0xf] }
 0x624   : > { %1354 = vst [vmem:[#allocation1 + $0x11] ss:$2 sm:$0xff] %v1348_v18 }
 0x625   : > { %1346 = vst.msk [vmem:[#allocation3 + $0x10] sm:$0xf] %vm334_vm5, %v1340_v19 }
 0x628   : > { %v2306_v20 = vld.sshfl [vmem:[#allocation1] sm:$0xff pattern:$0x75316420]  ;;  %v1356_v21 = vld.sshfl [vmem:[#allocation1 + $0x8] sm:$0xff pattern:$0x75316420] }
 0x629   : > { %1376 = vst [vmem:[#allocation1] ss:$2 sm:$0xff] %v2301_v13  ;;  %1360 = vrot.lane.b32.xlu0 %v1356_v21, %s1936_s11 }
 0x62b   : > { %v1357_v24 = vld.sshfl [vmem:[#allocation1 + $0x10] sm:$0xff pattern:$0x75316420] }
 0x62c   : > { %1362 = vrot.lane.b32.xlu1 %v1357_v24, %s1936_s11  ;;  %1378 = vst [vmem:[#allocation1 + $0x10] ss:$2 sm:$0xff] %v1373_v23 }
 0x630   : > { %v1379_v25 = vld.sshfl [vmem:[#allocation1] sm:$0xff pattern:$0x75316420]  ;;  %v1380_v26 = vld.sshfl [vmem:[#allocation1 + $0x8] sm:$0xff pattern:$0x75316420] }
 0x631   : > { %1401 = vst [vmem:[#allocation1 + $0x1] ss:$2 sm:$0xff] %v2301_v13  ;;  %1384 = vrot.lane.b32.xlu2 %v1380_v26, %s1937_s12 }
 0x633   : > { %v1381_v28 = vld.sshfl [vmem:[#allocation1 + $0x10] sm:$0xff pattern:$0x75316420] }
 0x634   : > { %1386 = vrot.lane.b32.xlu0 %v1381_v28, %s1937_s12  ;;  %1403 = vst [vmem:[#allocation1 + $0x11] ss:$2 sm:$0xff] %v1397_v27 }
 0x638   : > { %v1404_v29 = vld.sshfl [vmem:[#allocation1] sm:$0xff pattern:$0x75316420]  ;;  %v1405_v30 = vld.sshfl [vmem:[#allocation1 + $0x8] sm:$0xff pattern:$0x75316420] }
 0x639   : > { %1425 = vst [vmem:[#allocation1] ss:$2 sm:$0xff] %v2301_v13  ;;  %1409 = vrot.lane.b32.xlu1 %v1405_v30, %s1938_s13 }
 0x63b   : > { %v1406_v32 = vld.sshfl [vmem:[#allocation1 + $0x10] sm:$0xff pattern:$0x75316420] }
 0x63c   : > { %1411 = vrot.lane.b32.xlu2 %v1406_v32, %s1938_s13  ;;  %1427 = vst [vmem:[#allocation1 + $0x10] ss:$2 sm:$0xff] %v1422_v31 }
 0x640   : > { %v1428_v33 = vld.sshfl [vmem:[#allocation1] sm:$0xff pattern:$0x75316420]  ;;  %v1429_v34 = vld.sshfl [vmem:[#allocation1 + $0x8] sm:$0xff pattern:$0x75316420] }
 0x641   : > { %1450 = vst [vmem:[#allocation1 + $0x1] ss:$2 sm:$0xff] %v2301_v13  ;;  %1433 = vrot.lane.b32.xlu1 %v1429_v34, %s1939_s14 }
 0x643   : > { %v1430_v36 = vld.sshfl [vmem:[#allocation1 + $0x10] sm:$0xff pattern:$0x75316420] }
 0x644   : > { %1435 = vrot.lane.b32.xlu2 %v1430_v36, %s1939_s14  ;;  %1452 = vst [vmem:[#allocation1 + $0x11] ss:$2 sm:$0xff] %v1446_v35  ;;  %v1852_v36 = vld [vmem:[%s2432_s1 + $0xc] sm:$0xf] }
 0x648   : > { %v1453_v37 = vld.sshfl [vmem:[#allocation1] sm:$0xff pattern:$0x75316420]  ;;  %v1454_v38 = vld.sshfl [vmem:[#allocation1 + $0x8] sm:$0xff pattern:$0x75316420] }
 0x649   : > { %1474 = vst [vmem:[#allocation1] ss:$2 sm:$0xff] %v2301_v13  ;;  %1458 = vrot.lane.b32.xlu0 %v1454_v38, %s1940_s18 }
 0x64b   : > { %v1455_v40 = vld.sshfl [vmem:[#allocation1 + $0x10] sm:$0xff pattern:$0x75316420] }
 0x64c   : > { %1460 = vrot.lane.b32.xlu1 %v1455_v40, %s1940_s18  ;;  %1476 = vst [vmem:[#allocation1 + $0x10] ss:$2 sm:$0xff] %v1471_v39 }
 0x650   : > { %v1477_v41 = vld.sshfl [vmem:[#allocation1] sm:$0xff pattern:$0x75316420]  ;;  %v1478_v42 = vld.sshfl [vmem:[#allocation1 + $0x8] sm:$0xff pattern:$0x75316420] }
 0x651   : > { %1499 = vst [vmem:[#allocation1 + $0x1] ss:$2 sm:$0xff] %v2301_v13  ;;  %1482 = vrot.lane.b32.xlu0 %v1478_v42, %s1941_s19 }
 0x653   : > { %v1479_v44 = vld.sshfl [vmem:[#allocation1 + $0x10] sm:$0xff pattern:$0x75316420] }
 0x654   : > { %1484 = vrot.lane.b32.xlu1 %v1479_v44, %s1941_s19  ;;  %1501 = vst [vmem:[#allocation1 + $0x11] ss:$2 sm:$0xff] %v1495_v43 }
 0x658   : > { %v1502_v45 = vld.sshfl [vmem:[#allocation1] sm:$0xff pattern:$0x75316420]  ;;  %v1503_v46 = vld.sshfl [vmem:[#allocation1 + $0x8] sm:$0xff pattern:$0x75316420] }
 0x659   : > { %1480 = vrot.lane.b32.xlu0 %v1477_v41, %s1941_s19  ;;  %1507 = vrot.lane.b32.xlu2 %v1503_v46, %s1942_s20  ;;  %1523 = vst [vmem:[#allocation1] ss:$2 sm:$0xff] %v2301_v13 }
 0x65b   : > { %v1504_v48 = vld.sshfl [vmem:[#allocation1 + $0x10] sm:$0xff pattern:$0x75316420] }
 0x65c   : > { %1525 = vst [vmem:[#allocation1 + $0x10] ss:$2 sm:$0xff] %v1520_v47 }
 0x660   : > { %v1527_v49 = vld.sshfl [vmem:[#allocation1 + $0x8] sm:$0xff pattern:$0x75316420]  ;;  %v1526_v51 = vld.sshfl [vmem:[#allocation1] sm:$0xff pattern:$0x75316420] }
 0x661   : > { %1509 = vrot.lane.b32.xlu0 %v1504_v48, %s1942_s20  ;;  %1431 = vrot.lane.b32.xlu2 %v1428_v33, %s1939_s14  ;;  %s1947_s14 = smov 88  }
 0x662   : > { %1531 = vrot.lane.b32.xlu1 %v1527_v49, %s1943_s21 }
 0x663   : > { %v1528_v50 = vld.sshfl [vmem:[#allocation1 + $0x10] sm:$0xff pattern:$0x75316420] }
 0x669   : > { %1456 = vrot.lane.b32.xlu0 %v1453_v37, %s1940_s18  ;;  %1533 = vrot.lane.b32.xlu2 %v1528_v50, %s1943_s21  ;;  %s1948_s18 = smov 86  }
 0x66a   : > { %1505 = vrot.lane.b32.xlu1 %v1502_v45, %s1942_s20  ;;  %s1949_s20 = smov 72  }
 0x671   : > { %1358 = vrot.lane.b32.xlu0 %v2306_v20, %s1936_s11  ;;  %1529 = vrot.lane.b32.xlu2 %v1526_v51, %s1943_s21 }
 0x672   : > { %1382 = vrot.lane.b32.xlu1 %v1379_v25, %s1937_s12 }
 0x679   : > { %1407 = vrot.lane.b32.xlu2 %v1404_v29, %s1938_s13  ;;  %s1946_s13 = smov 74  }
 0x67a   : > { %1564 = vperm.xlu1 %1909, %v1853_v52  }
 0x68b   : > { %v2343_v53 = vpop.permute.xlu2 %1384 }
 0x696   : > { %v1412_v54 = vpop.permute.xlu2 %1411 }
 0x697   : > { %1420 = vst.msk [vmem:[#allocation3 + $0x28] sm:$0xf0] %vm361_vm6, %v1412_v54 }
 0x69b   : > { %v2346_v55 = vpop.permute.xlu0 %1360 }
 0x69e   : > { %v1363_v56 = vpop.permute.xlu1 %1362  ;;  %v1436_v57 = vpop.permute.xlu2 %1435 }
 0x69f   : > { %v1365_v58 = vsel %vm353_vm7, %v2346_v55, %v1363_v56  ;;  %1371 = vst.msk [vmem:[#allocation3 + $0x10] sm:$0xf0] %vm361_vm6, %v1363_v56 }
 0x6a0   : > { %1370 = vst [vmem:[#allocation3 + $0x8] sm:$0xf0] %v1365_v58 }
 0x6a1   : > { %1444 = vst.msk [vmem:[#allocation3 + $0x40] sm:$0xf] %vm334_vm5, %v1436_v57 }
 0x6a6   : > { %v1387_v59 = vpop.permute.xlu0 %1386  ;;  %v1547_v37 = vld [vmem:[#allocation3 + $0x10] sm:$0xff] }
 0x6a7   : > { %v1389_v60 = vsel %vm379_vm9, %v2343_v53, %v1387_v59  ;;  %1395 = vst.msk [vmem:[#allocation3 + $0x28] sm:$0xf] %vm334_vm5, %v1387_v59  ;;  %v1546_v45 = vld [vmem:[#allocation3 + $0x8] sm:$0xff] }
 0x6a8   : > { %1394 = vst [vmem:[#allocation3 + $0x20] sm:$0xf] %v1389_v60 }
 0x6ab   : > { %v1410_v61 = vpop.permute.xlu1 %1409 }
 0x6ac   : > { %v1414_v62 = vsel %vm405_vm8, %v1410_v61, %v1412_v54 }
 0x6ad   : > { %1419 = vst [vmem:[#allocation3 + $0x20] sm:$0xf0] %v1414_v62 }
 0x6ae   : > { %v1550_v34 = vld [vmem:[#allocation3 + $0x28] sm:$0xff] }
 0x6b3   : > { %v1434_v63 = vpop.permute.xlu1 %1433  ;;  %v1508_v0 = vpop.permute.xlu2 %1507 }
 0x6b4   : > { %v1438_v1 = vsel %vm430_vm10, %v1434_v63, %v1436_v57  ;;  %v1549_v41 = vld [vmem:[#allocation3 + $0x20] sm:$0xff] }
 0x6b5   : > { %1443 = vst [vmem:[#allocation3 + $0x38] sm:$0xf] %v1438_v1 }
 0x6bb   : > { %v1459_v2 = vpop.permute.xlu0 %1458  ;;  %v1432_v3 = vpop.permute.xlu2 %1431 }
 0x6bc   : > { %v1437_v4 = vsel %vm430_vm10, %v1432_v3, %v1434_v63  ;;  %vm2449_vm10 = vcmask 736256  }
 0x6bd   : > { %1442 = vst [vmem:[#allocation3 + $0x30] sm:$0xf] %v1437_v4 }
 0x6be   : > { %v1461_v5 = vpop.permute.xlu1 %1460 }
 0x6bf   : > { %v1463_v7 = vsel %vm456_vm11, %v1459_v2, %v1461_v5  ;;  %1469 = vst.msk [vmem:[#allocation3 + $0x40] sm:$0xf0] %vm361_vm6, %v1461_v5 }
 0x6c0   : > { %1468 = vst [vmem:[#allocation3 + $0x38] sm:$0xf0] %v1463_v7 }
 0x6c3   : > { %v1483_v8 = vpop.permute.xlu0 %1482  ;;  %v1534_v9 = vpop.permute.xlu2 %1533 }
 0x6c4   : > { %1542 = vst.msk [vmem:[#allocation3 + $0x70] sm:$0xf] %vm334_vm5, %v1534_v9 }
 0x6c6   : > { %v1485_v10 = vpop.permute.xlu1 %1484  ;;  %v1553_v32 = vld [vmem:[#allocation3 + $0x40] sm:$0xff] }
 0x6c7   : > { %v1487_v11 = vsel %vm481_vm12, %v1483_v8, %v1485_v10  ;;  %1493 = vst.msk [vmem:[#allocation3 + $0x58] sm:$0xf] %vm334_vm5, %v1485_v10  ;;  %vm2450_vm5 = vmmov %vm2449_vm10  ;;  %v1552_v38 = vld [vmem:[#allocation3 + $0x38] sm:$0xff] }
 0x6c8   : > { %1492 = vst [vmem:[#allocation3 + $0x50] sm:$0xf] %v1487_v11 }
 0x6cb   : > { %v1481_v13 = vpop.permute.xlu0 %1480  ;;  %v1530_v14 = vpop.permute.xlu2 %1529  ;;  %v1559_v15 = vld [vmem:[#allocation3 + $0x70] sm:$0xf] }
 0x6cc   : > { %v1486_v17 = vsel %vm481_vm12, %v1481_v13, %v1483_v8  ;;  %1858 = vmatpush.msk.msra.mxu3 %vm567_vm14, %v1559_v15  ;;  %vm1685_vm12 = vcmask 519552  }
 0x6cd   : > { %1491 = vst [vmem:[#allocation3 + $0x48] sm:$0xf] %v1486_v17 }
 0x6d3   : > { %v1510_v18 = vpop.permute.xlu0 %1509  ;;  %v1408_v19 = vpop.permute.xlu2 %1407 }
 0x6d4   : > { %v1512_v20 = vsel %vm507_vm15, %v1508_v0, %v1510_v18  ;;  %1518 = vst.msk [vmem:[#allocation3 + $0x58] sm:$0xf0] %vm361_vm6, %v1510_v18  ;;  %v1532_v21 = vpop.permute.xlu1 %1531  ;;  %v1413_v25 = vsel %vm405_vm8, %v1408_v19, %v1410_v61  ;;  %vm2451_vm6 = vmmov %vm2447_vm0 }
 0x6d5   : > { %1517 = vst [vmem:[#allocation3 + $0x50] sm:$0xf0] %v1512_v20  ;;  %v1535_v23 = vsel %vm2449_vm10, %v1530_v14, %v1532_v21  ;;  %v1536_v24 = vsel %vm2450_vm5, %v1532_v21, %v1534_v9  ;;  %vm2452_vm8 = vmmov %vm2447_vm0 }
 0x6d6   : > { %1540 = vst [vmem:[#allocation3 + $0x60] sm:$0xf] %v1535_v23 }
 0x6d7   : > { %1541 = vst [vmem:[#allocation3 + $0x68] sm:$0xf] %v1536_v24 }
 0x6d8   : > { %1418 = vst [vmem:[#allocation3 + $0x18] sm:$0xf0] %v1413_v25 }
 0x6db   : > { %v1457_v26 = vpop.permute.xlu0 %1456  ;;  %v1556_v27 = vld [vmem:[#allocation3 + $0x58] sm:$0xff] }
 0x6dc   : > { %v1462_v28 = vsel %vm456_vm11, %v1457_v26, %v1459_v2  ;;  %v1506_v29 = vpop.permute.xlu1 %1505  ;;  %1631 = vmatpush.msra.mxu3 %v1556_v27  ;;  %v1555_v35 = vld [vmem:[#allocation3 + $0x50] sm:$0xff]  ;;  %vm1678_vm11 = vcmask 388352  }
 0x6dd   : > { %1467 = vst [vmem:[#allocation3 + $0x30] sm:$0xf0] %v1462_v28  ;;  %v1511_v30 = vsel %vm507_vm15, %v1506_v29, %v1508_v0  ;;  %v1557_v31 = vld [vmem:[#allocation3 + $0x60] sm:$0xf]  ;;  %vm1744_vm15 = vcmask 539648  }
 0x6de   : > { %1516 = vst [vmem:[#allocation3 + $0x48] sm:$0xf0] %v1511_v30  ;;  %1854 = vmatpush.msk.msra.mxu1 %vm567_vm14, %v1557_v31  ;;  %v1558_v33 = vld [vmem:[#allocation3 + $0x68] sm:$0xf]  ;;  %1632 = vmatpush.msra.mxu3 %v1553_v32 }
 0x6df   : > { %1856 = vmatpush.msk.msra.mxu2 %vm567_vm14, %v1558_v33 }
 0x6e0   : > { %1633 = vmatpush.msra.mxu3 %v1550_v34 }
 0x6e1   : > { %1611 = vmatpush.msra.mxu2 %v1555_v35 }
 0x6e2   : > { %1634 = vmatpush.msra.mxu3 %v1547_v37 }
 0x6e3   : > { %1612 = vmatpush.msra.mxu2 %v1552_v38  ;;  %v1359_v39 = vpop.permute.xlu0 %1358  ;;  %1859 = vmatmul.msk.f32.vlgmr.msra.gmra.mxu3 %vm2451_vm6, %v1852_v36 }
 0x6e4   : > { %v1364_v40 = vsel %vm353_vm7, %v1359_v39, %v2346_v55  ;;  %v1383_v42 = vpop.permute.xlu1 %1382  ;;  %v1551_v46 = vld [vmem:[#allocation3 + $0x30] sm:$0xff]  ;;  %vm2453_vm7 = vmmov %vm2447_vm0  ;;  %vm1706_vm0 = vcmask 913152  }
 0x6e5   : > { %1369 = vst [vmem:[#allocation3] sm:$0xf0] %v1364_v40  ;;  %1613 = vmatpush.msra.mxu2 %v1549_v41  ;;  %v1388_v43 = vsel %vm379_vm9, %v1383_v42, %v2343_v53  ;;  %v1554_v44 = vld [vmem:[#allocation3 + $0x48] sm:$0xff]  ;;  %vm2456_vm9 = vcmask 257152  }
 0x6e6   : > { %1393 = vst [vmem:[#allocation3 + $0x18] sm:$0xf] %v1388_v43  ;;  %1591 = vmatpush.msra.mxu1 %v1554_v44 }
 0x6e7   : > { %1614 = vmatpush.msra.mxu2 %v1546_v45 }
 0x6e8   : > { %1857 = vmatmul.msk.f32.vlgmr.msra.gmra.mxu2 %vm2452_vm8, %v1852_v36  ;;  %1592 = vmatpush.msra.mxu1 %v1551_v46 }
 0x6ec   : > { %v1545_v48 = vld [vmem:[#allocation3] sm:$0xff]  ;;  %v1565_v49 = vpop.permute.xlu1 %1564 }
 0x6ed   : > { %v1548_v47 = vld [vmem:[#allocation3 + $0x18] sm:$0xff] }
 0x6ee   : > { %1593 = vmatpush.msra.mxu1 %v1548_v47 }
 0x6f0   : > { %1594 = vmatpush.msra.mxu1 %v1545_v48 }
 0x6f1   : > { %1855 = vmatmul.msk.f32.vlgmr.msra.gmra.mxu1 %vm2453_vm7, %v1852_v36 }
 0x766   : > { %v1636_v50 = vpop.f32.mrf.mxu3 }
 0x767   : > { %v1637_v51 = vadd.f32 %v1636_v50, %v1565_v49 }
 0x769   : > { %v1641_v52 = vmax.f32 %v1637_v51, 0.0 }
 0x76b   : > { %v1644_v53 = vmul.f32 %v1641_v52, %v2111_v6  ;;  %v1616_v54 = vpop.f32.mrf.mxu2 }
 0x76c   : > { %v1617_v55 = vadd.f32 %v1616_v54, %v1565_v49 }
 0x76d   : > { %1652 = vrot.lane.b32.xlu0 %v1644_v53, %s1945_s30 }
 0x76e   : > { %v1640_v56 = vmax.f32 %v1617_v55, 0.0  ;;  %v1596_v57 = vpop.f32.mrf.mxu1 }
 0x76f   : > { %v1597_v58 = vadd.f32 %v1596_v57, %v1565_v49 }
 0x770   : > { %v1643_v59 = vmul.f32 %v1640_v56, %v2115_v12 }
 0x771   : > { %v1639_v60 = vmax.f32 %v1597_v58, 0.0 }
 0x772   : > { %v1648_v61 = vrot.slane %v1643_v59, 4 }
 0x773   : > { %v1642_v62 = vmul.f32 %v1639_v60, %v2118_v16 }
 0x775   : > { %v1649_v63 = vsel %vm567_vm14, %v1642_v62, %v1648_v61  ;;  %vm2457_vm14 = vmmov %vm2456_vm9 }
 0x776   : > { %1650 = vrot.lane.b32.xlu2 %v1649_v63, %s1945_s30  ;;  %s1950_s30 = smov 70  }
 0x7d0   : > { %v1651_v0 = vpop.permute.xlu2 %1650 }
 0x7d1   : > { %v1654_v1 = vrot.slane %v1651_v0, 4 }
 0x7d3   : > { %v1655_v6 = vsel %vm660_vm13, %v1654_v1, %v1651_v0 }
 0x7d4   : > { %1659 = vst.msk [vmem:[#allocation2] sm:$0xff] %vm2123_vm1, %v1655_v6  ;;  %vm2454_vm1 = vcmask 125952  }
 0x7db   : > { %v1715_v2 = vld [vmem:[#allocation2 + $0x4] sm:$0xf]  ;;  %v1667_v3 = vld [vmem:[#allocation2] sm:$0xf] }
 0x7dc   : > { %v1661_v4 = vld [vmem:[#allocation2] sm:$0xf]  ;;  %1717 = vrot.lane.b32.xlu2 %v1715_v2, %s1946_s13  ;;  %1669 = vrot.lane.b32.xlu0 %v1667_v3, %s1947_s14  ;;  %v1721_v7 = vld [vmem:[#allocation2 + $0x4] sm:$0xf] }
 0x7dd   : > { %1663 = vrot.lane.b32.xlu1 %v1661_v4, %s1943_s21  ;;  %v1673_v5 = vld [vmem:[#allocation2] sm:$0xf]  ;;  %v1733_v8 = vld [vmem:[#allocation2 + $0x4] sm:$0xf]  ;;  %s1951_s21 = smov 84  }
 0x7de   : > { %v1727_v9 = vld [vmem:[#allocation2 + $0x4] sm:$0xf]  ;;  %v1680_v10 = vld [vmem:[#allocation2] sm:$0xf] }
 0x7df   : > { %v1653_v12 = vpop.permute.xlu0 %1652  ;;  %v1687_v13 = vld [vmem:[#allocation2] sm:$0xf]  ;;  %v1694_v14 = vld [vmem:[#allocation2 + $0x4] sm:$0xf] }
 0x7e0   : > { %v1656_v16 = vsel %vm660_vm13, %v1654_v1, %v1653_v12  ;;  %v1708_v15 = vld [vmem:[#allocation2 + $0x4] sm:$0xf]  ;;  %vm2455_vm13 = vmmov %vm2454_vm1 }
 0x7e1   : > { %1660 = vst.msk [vmem:[#allocation2 + $0x8] sm:$0xf] %vm669_vm2, %v1656_v16  ;;  %v1701_v17 = vld [vmem:[#allocation2 + $0x4] sm:$0xf]  ;;  %vm1692_vm2 = vcmask 650752  }
 0x7e4   : > { %1675 = vrot.lane.b32.xlu0 %v1673_v5, %s1948_s18 }
 0x7e5   : > { %1723 = vrot.lane.b32.xlu1 %v1721_v7, %s1949_s20 }
 0x7e8   : > { %v1739_v22 = vld [vmem:[#allocation2 + $0x4] sm:$0xff] }
 0x7e9   : > { %1741 = vrot.lane.b32.xlu2 %v1739_v22, %s1932_s8  ;;  %v1748_v11 = vld [vmem:[#allocation2 + $0x8] sm:$0xf]  ;;  %s1954_s8 = smov 76  }
 0x7ea   : > { %v1754_v18 = vld [vmem:[#allocation2 + $0x8] sm:$0xf] }
 0x7eb   : > { %v1760_v19 = vld [vmem:[#allocation2 + $0x8] sm:$0xf] }
 0x7ec   : > { %1735 = vrot.lane.b32.xlu0 %v1733_v8, %s1934_s10  ;;  %s1955_s10 = smov 78  }
 0x7ed   : > { %1729 = vrot.lane.b32.xlu1 %v1727_v9, %s1950_s30 }
 0x7f1   : > { %1682 = vrot.lane.b32.xlu2 %v1680_v10, %s1951_s21 }
 0x7f4   : > { %1750 = vrot.lane.b32.xlu0 %v1748_v11, %s1930_s6 }
 0x7f5   : > { %1689 = vrot.lane.b32.xlu1 %v1687_v13, %s1952_s5 }
 0x7f9   : > { %1696 = vrot.lane.b32.xlu2 %v1694_v14, %s1953_s7 }
 0x7fc   : > { %1710 = vrot.lane.b32.xlu0 %v1708_v15, %s1954_s8 }
 0x7fd   : > { %1703 = vrot.lane.b32.xlu1 %v1701_v17, %s1955_s10 }
 0x801   : > { %1756 = vrot.lane.b32.xlu2 %v1754_v18, %s1924_s26 }
 0x805   : > { %1762 = vrot.lane.b32.xlu1 %v1760_v19, %s1927_s29 }
 0x836   : > { %v1718_v20 = vpop.permute.xlu2 %1717 }
 0x837   : > { %1720 = vst.msk [vmem:[%s2406_s22 + $0x4] sm:$0xf] %vm2454_vm1, %v1718_v20 }
 0x843   : > { %v1742_v21 = vpop.permute.xlu2 %1741 }
 0x844   : > { %v1743_v28 = vrot.slane %v1742_v21, 4 }
 0x846   : > { %v1745_v32 = vsel %vm1744_vm15, %v1742_v21, %v1743_v28 }
 0x84b   : > { %v1683_v25 = vpop.permute.xlu2 %1682 }
 0x84e   : > { %v1670_v23 = vpop.permute.xlu0 %1669 }
 0x84f   : > { %v1664_v24 = vpop.permute.xlu1 %1663 }
 0x850   : > { %1666 = vst.msk [vmem:[%s2406_s22] sm:$0xf] %vm2455_vm13, %v1664_v24 }
 0x851   : > { %1672 = vst.msk [vmem:[%s2406_s22] sm:$0xf] %vm2456_vm9, %v1670_v23 }
 0x853   : > { %v1697_v30 = vpop.permute.xlu2 %1696 }
 0x856   : > { %v1676_v26 = vpop.permute.xlu0 %1675 }
 0x857   : > { %1679 = vst.msk [vmem:[%s2406_s22] sm:$0xf] %vm1678_vm11, %v1676_v26  ;;  %v1724_v27 = vpop.permute.xlu1 %1723 }
 0x858   : > { %1726 = vst.msk [vmem:[%s2406_s22 + $0x4] sm:$0xf] %vm2457_vm14, %v1724_v27 }
 0x859   : > { %1686 = vst.msk [vmem:[%s2406_s22] sm:$0xf] %vm1685_vm12, %v1683_v25 }
 0x85b   : > { %v1757_v35 = vpop.permute.xlu2 %1756 }
 0x85e   : > { %v1736_v29 = vpop.permute.xlu0 %1735 }
 0x85f   : > { %v1730_v31 = vpop.permute.xlu1 %1729 }
 0x860   : > { %1732 = vst.msk [vmem:[%s2406_s22 + $0x4] sm:$0xf] %vm1678_vm11, %v1730_v31 }
 0x861   : > { %1738 = vst.msk [vmem:[%s2406_s22 + $0x4] sm:$0xf] %vm1685_vm12, %v1736_v29 }
 0x862   : > { %1747 = vst.msk [vmem:[%s2406_s22 + $0x4] sm:$0xf] %vm1692_vm2, %v1745_v32 }
 0x866   : > { %v1751_v33 = vpop.permute.xlu0 %1750 }
 0x867   : > { %1753 = vst.msk [vmem:[%s2406_s22 + $0x4] sm:$0xf] %vm1699_vm4, %v1751_v33  ;;  %v1690_v34 = vpop.permute.xlu1 %1689 }
 0x868   : > { %1693 = vst.msk [vmem:[%s2406_s22] sm:$0xf] %vm1692_vm2, %v1690_v34 }
 0x869   : > { %1700 = vst.msk [vmem:[%s2406_s22] sm:$0xf] %vm1699_vm4, %v1697_v30 }
 0x86a   : > { %1759 = vst.msk [vmem:[%s2406_s22 + $0x4] sm:$0xf] %vm1706_vm0, %v1757_v35 }
 0x86e   : > { %v1711_v36 = vpop.permute.xlu0 %1710 }
 0x86f   : > { %v1704_v37 = vpop.permute.xlu1 %1703 }
 0x870   : > { %1707 = vst.msk [vmem:[%s2406_s22] sm:$0xf] %vm1706_vm0, %v1704_v37 }
 0x871   : > { %1714 = vst.msk [vmem:[%s2406_s22] sm:$0xf] %vm1713_vm3, %v1711_v36 }
 0x877   : > { %v1763_v38 = vpop.permute.xlu1 %1762 }
 0x878   : > { %1765 = vst.msk [vmem:[%s2406_s22 + $0x4] sm:$0xf] %vm1713_vm3, %v1763_v38 }
 0x879 PF: > { %s14_s15 = sadd.s32 1, %s1917_s15  }
 0x87a   : > { %p11_p4 = scmp.ge.s32.totalorder %s14_s15, 4  }
 0x87c   :  { %13 = sbr.rel (!%p11_p4) target bundleno = 1 (0x1), region = 124 }

</bundles_post_ra>
